<compile_context>
chip_gen: v7x
topology: tpu7x:2x2x1
jax: 0.10.0
libtpu: 0.0.40
codegen_flags: <defaults>
</compile_context>

<pallas_src>
import jax
import jax.numpy as jnp
from jax.experimental import pallas as pl
from jax.experimental.pallas import tpu as pltpu

BN_EPS = 1e-5


# ---------------------------------------------------------------------------
# Fused kernel: layer-0 rank-1 -> 3 full GIN layers -> one K=5*HP head matmul
# ---------------------------------------------------------------------------
def _multi_gin_kernel(adj_ref, w1r0_ref, w1_ref, w2_ref, bias_ref, wp_ref, bsum_ref, out_ref):
    num_gin = w2_ref.shape[0]                 # 4 GIN layers
    n = adj_ref.shape[0]
    hp = w2_ref.shape[-1]                     # lane-dense feature width (128)
    f32, bf16 = jnp.float32, jnp.bfloat16

    adjI = adj_ref[...]                       # (N, N) bf16, equals A + I

    # ---- h0 = g.in_degrees().view(-1,1), layer-0 specialization (input_dim == 1) ----
    deg = jnp.sum(adjI, axis=1, keepdims=True) - 1.0        # (N,1) bf16, exact (integers <= N)
    sum_deg = jnp.sum(deg.astype(f32))                      # raw node-sum of h0 (mean folded later)
    lane = jax.lax.broadcasted_iota(jnp.int32, (1, hp), 1)
    pooled = [jnp.where(lane == 0, sum_deg, 0.0)]           # (1,HP) head input for hidden_rep[0]

    d = jnp.dot(adjI, deg, preferred_element_type=f32)      # (N,1) = (A+I) @ h0
    b0 = bias_ref[0]                                        # (2, HP): BN1 bias, BN2 bias
    z1 = jnp.maximum(d * w1r0_ref[...] + b0[0:1, :], 0.0)   # rank-1 lin1 (BN1-scaled) + bias + ReLU
    z2 = jnp.dot(z1.astype(bf16), w2_ref[0], preferred_element_type=f32)
    h = jnp.maximum(z2 + b0[1:2, :], 0.0)                   # outer BN + ReLU
    pooled.append(jnp.sum(h, axis=0, keepdims=True))        # raw node-sum (AvgPool scale folded)
    h_b = h.astype(bf16)

    # ---- GIN layers 1..3, fully unrolled; h never leaves vregs/VMEM ----
    for l in range(1, num_gin):
        b_l = bias_ref[l]
        agg = jnp.dot(adjI, h_b, preferred_element_type=f32)                 # (A+I) @ h
        z1 = jnp.dot(agg.astype(bf16), w1_ref[l - 1], preferred_element_type=f32)
        z1 = jnp.maximum(z1 + b_l[0:1, :], 0.0)                              # BN1 bias + ReLU
        z2 = jnp.dot(z1.astype(bf16), w2_ref[l], preferred_element_type=f32)
        h = jnp.maximum(z2 + b_l[1:2, :], 0.0)                               # BN2 bias + ReLU
        pooled.append(jnp.sum(h, axis=0, keepdims=True))
        h_b = h.astype(bf16)

    # ---- single epilogue: one K = 5*HP head matmul + hardsigmoid ----
    big = jnp.concatenate(pooled, axis=1)                                    # (1, 5*HP) raw sums
    acc = jnp.dot(big.astype(bf16), wp_ref[...], preferred_element_type=f32)  # (1, PP)
    inv = 1.0 / (6.0 * float(num_gin + 1) * float(n))       # 1/6 (hardsigmoid) * 1/5 * 1/N (mean)
    out_ref[...] = jnp.clip(acc * inv + bsum_ref[...] + 0.5, 0.0, 1.0)


def _const_spec(shape):
    nd = len(shape)
    return pl.BlockSpec(shape, lambda b, nd=nd: (0,) * nd)


def multi_gin_forward(adj, params):
    """Multi_GIN.forward over a batch of graphs.

    adj: (B, N, N) (or (N, N)) with adj[b, v, u] = 1 iff edge u -> v in graph b.
    Returns (pt, yc, lc, cc), each hardsigmoid-activated, shapes (B,1),(B,out),(B,out),(B,1).
    """
    if adj.ndim == 2:
        adj = adj[None]
    B, N, _ = adj.shape
    # TODO(synk): for very large N, adj should be row-tiled over a pipelined grid axis (v7x has
    # only 64 MiB physical / 32 MiB scoped VMEM, half of v5e/v6e).

    # GIN eps = 0 => aggregation is (A + I) h; precompute once, bf16 is exact for 0/1 entries.
    adjI = (adj + jnp.eye(N, dtype=adj.dtype)).astype(jnp.bfloat16)

    w1r0, w1, w2, bias = params["w1r0"], params["w1"], params["w2"], params["bias"]
    wp, bsum = params["wp"], params["bsum"]
    PP = wp.shape[-1]

    out = pl.pallas_call(
        _multi_gin_kernel,
        out_shape=jax.ShapeDtypeStruct((B, 1, PP), jnp.float32),
        grid=(B,),
        in_specs=[
            pl.BlockSpec((None, N, N), lambda b: (b, 0, 0)),   # per-graph adjacency block
            _const_spec(w1r0.shape),                           # weights: constant block index ->
            _const_spec(w1.shape),                             # VMEM-resident across grid steps
            _const_spec(w2.shape),
            _const_spec(bias.shape),
            _const_spec(wp.shape),
            _const_spec(bsum.shape),
        ],
        out_specs=pl.BlockSpec((None, 1, PP), lambda b: (b, 0, 0)),
        compiler_params=pltpu.CompilerParams(dimension_semantics=("parallel",)),
    )(adjI, w1r0, w1, w2, bias, wp, bsum)

    out = out[:, 0, :]
    P = params["dims"]["P"]
    out_dim = params["dims"]["output_dim"]
    scores = out[:, :P]                                        # strip lane padding
    pt = scores[:, 0:1]
    yc = scores[:, 1:1 + out_dim]
    lc = scores[:, 1 + out_dim:1 + 2 * out_dim]
    cc = scores[:, 1 + 2 * out_dim:2 + 2 * out_dim]
    return pt, yc, lc, cc


# ---------------------------------------------------------------------------
# Deterministic parameter construction (torch shapes -> folded / padded / packed)
# ---------------------------------------------------------------------------
def fold_bn(gamma, beta, mean, var):
    s = gamma / jnp.sqrt(var + BN_EPS)
    b = beta - mean * s
    return s, b


def init_params(key, input_dim, hidden_dim, output_dim, num_layers=5):
    HP = max(128, ((hidden_dim + 127) // 128) * 128)           # lane-dense feature width
    P = 1 + output_dim + output_dim + 1                        # [pt | yc | lc | cc]
    PP = max(128, ((P + 127) // 128) * 128)                    # lane-dense head width
    num_gin = num_layers - 1
    assert input_dim == 1, "layer-0 rank-1 specialization assumes input_dim == 1 (in-degree feature)"

    w1r0 = None
    w1_list, w2_list, bias_list = [], [], []
    for layer in range(num_gin):
        din = input_dim if layer == 0 else hidden_dim
        key, *ks = jax.random.split(key, 11)
        w1 = jax.random.normal(ks[0], (hidden_dim, din), jnp.float32) * 0.2      # torch (out, in)
        w2 = jax.random.normal(ks[1], (hidden_dim, hidden_dim), jnp.float32) * 0.2
        g1 = 1.0 + 0.1 * jax.random.normal(ks[2], (hidden_dim,), jnp.float32)
        be1 = 0.1 * jax.random.normal(ks[3], (hidden_dim,), jnp.float32)
        m1 = 0.1 * jax.random.normal(ks[4], (hidden_dim,), jnp.float32)
        v1 = jax.random.uniform(ks[5], (hidden_dim,), jnp.float32, 0.5, 1.5)
        g2 = 1.0 + 0.1 * jax.random.normal(ks[6], (hidden_dim,), jnp.float32)
        be2 = 0.1 * jax.random.normal(ks[7], (hidden_dim,), jnp.float32)
        m2 = 0.1 * jax.random.normal(ks[8], (hidden_dim,), jnp.float32)
        v2 = jax.random.uniform(ks[9], (hidden_dim,), jnp.float32, 0.5, 1.5)
        s1, b1 = fold_bn(g1, be1, m1, v1)
        s2, b2 = fold_bn(g2, be2, m2, v2)

        # Fold BN scale into the bias-free linear: relu(BN(x @ W.T)) == relu(x @ (W.T * s) + b).
        w1s = w1.T * s1[None, :]                                # (din, hidden)
        w2s = w2.T * s2[None, :]                                # (hidden, hidden)

        if layer == 0:
            w1r0 = jnp.zeros((1, HP), jnp.float32).at[0, :hidden_dim].set(w1s[0])
        else:
            w1_list.append(jnp.zeros((HP, HP), jnp.float32)
                           .at[:hidden_dim, :hidden_dim].set(w1s).astype(jnp.bfloat16))
        w2_list.append(jnp.zeros((HP, HP), jnp.float32)
                       .at[:hidden_dim, :hidden_dim].set(w2s).astype(jnp.bfloat16))
        bias = jnp.zeros((2, HP), jnp.float32)
        bias = bias.at[0, :hidden_dim].set(b1).at[1, :hidden_dim].set(b2)
        bias_list.append(bias)

    # Prediction heads: per layer pack [pt | yc | lc | cc] into an (HP, PP) block, then
    # concatenate the 5 blocks along K so the kernel does ONE (1, 5*HP) x (5*HP, PP) matmul.
    wp_blocks = []
    b_total = jnp.zeros((1, PP), jnp.float32)
    for layer in range(num_layers):
        din = input_dim if layer == 0 else hidden_dim
        key, *ks = jax.random.split(key, 9)
        wpt = jax.random.normal(ks[0], (1, din), jnp.float32) * 0.2
        bpt = 0.1 * jax.random.normal(ks[1], (1,), jnp.float32)
        wyc = jax.random.normal(ks[2], (output_dim, din), jnp.float32) * 0.2
        byc = 0.1 * jax.random.normal(ks[3], (output_dim,), jnp.float32)
        wlc = jax.random.normal(ks[4], (output_dim, din), jnp.float32) * 0.2
        blc = 0.1 * jax.random.normal(ks[5], (output_dim,), jnp.float32)
        wcc = jax.random.normal(ks[6], (1, din), jnp.float32) * 0.2
        bcc = 0.1 * jax.random.normal(ks[7], (1,), jnp.float32)
        w = jnp.concatenate([wpt, wyc, wlc, wcc], axis=0).T                     # (din, P)
        wp_blocks.append(jnp.zeros((HP, PP), jnp.float32).at[:din, :P].set(w))
        b = jnp.concatenate([bpt, byc, blc, bcc])                               # (P,)
        b_total = b_total.at[0, :P].add(b)                                      # biases sum over layers

    # Fold 1/len(hidden_rep) and the hardsigmoid 1/6 into the summed head bias; the pooled part
    # gets the matching 1/(6 * 5 * N) scale as a single vreg multiply inside the kernel.
    bsum = b_total / (6.0 * num_layers)

    return dict(
        w1r0=w1r0,                                                 # (1, HP) f32, layer-0 lin1 row
        w1=jnp.stack(w1_list),                                     # (num_gin-1, HP, HP) bf16
        w2=jnp.stack(w2_list),                                     # (num_gin,   HP, HP) bf16
        bias=jnp.stack(bias_list),                                 # (num_gin, 2, HP) f32
        wp=jnp.concatenate(wp_blocks, axis=0).astype(jnp.bfloat16),  # (num_layers*HP, PP) bf16
        bsum=bsum,                                                 # (1, PP) f32
        dims=dict(HP=HP, PP=PP, P=P, output_dim=output_dim),
    )


if __name__ == "__main__":
    key = jax.random.PRNGKey(0)
    B, N, input_dim, hidden_dim, output_dim = 2, 32, 1, 32, 4

    k_adj, k_par = jax.random.split(key)
    adj = (jax.random.uniform(k_adj, (B, N, N)) < 0.2).astype(jnp.float32)
    adj = adj * (1.0 - jnp.eye(N, dtype=jnp.float32))              # no self loops

    params = init_params(k_par, input_dim, hidden_dim, output_dim)

    pt, yc, lc, cc = jax.block_until_ready(multi_gin_forward(adj, params))

    assert pt.shape == (B, 1) and yc.shape == (B, output_dim)
    assert lc.shape == (B, output_dim) and cc.shape == (B, 1)
    assert bool(jnp.all(jnp.isfinite(jnp.concatenate([pt, yc, lc, cc], axis=1))))
    print("KERNEL_OK")
</pallas_src>

<mosaic_0001>
module attributes {stable_mosaic.version = 11 : i64} {
  func.func @_multi_gin_kernel(%arg0: i32, %arg1: memref<1x32x32xbf16, #tpu.memory_space<vmem>>, %arg2: memref<1x128xf32, #tpu.memory_space<vmem>>, %arg3: memref<3x128x128xbf16, #tpu.memory_space<vmem>>, %arg4: memref<4x128x128xbf16, #tpu.memory_space<vmem>>, %arg5: memref<4x2x128xf32, #tpu.memory_space<vmem>>, %arg6: memref<640x128xbf16, #tpu.memory_space<vmem>>, %arg7: memref<1x128xf32, #tpu.memory_space<vmem>>, %arg8: memref<1x1x128xf32, #tpu.memory_space<vmem>>) attributes {dimension_semantics = [#tpu.dimension_semantics<parallel>], iteration_bounds = array<i64: 2>, scalar_prefetch = 0 : i64, scratch_operands = 0 : i64, tpu.core_type = #tpu.core_type<tc>, window_params = [{transform_indices = @transform_0, window_bounds = array<i64: 1, 32, 32>}, {pipeline_mode = #tpu.pipeline_mode<synchronous>, transform_indices = @transform_1, window_bounds = array<i64: 1, 128>}, {pipeline_mode = #tpu.pipeline_mode<synchronous>, transform_indices = @transform_2, window_bounds = array<i64: 3, 128, 128>}, {pipeline_mode = #tpu.pipeline_mode<synchronous>, transform_indices = @transform_3, window_bounds = array<i64: 4, 128, 128>}, {pipeline_mode = #tpu.pipeline_mode<synchronous>, transform_indices = @transform_4, window_bounds = array<i64: 4, 2, 128>}, {pipeline_mode = #tpu.pipeline_mode<synchronous>, transform_indices = @transform_5, window_bounds = array<i64: 640, 128>}, {pipeline_mode = #tpu.pipeline_mode<synchronous>, transform_indices = @transform_6, window_bounds = array<i64: 1, 128>}, {transform_indices = @transform_7, window_bounds = array<i64: 1, 1, 128>}]} {
    %c0 = arith.constant 0 : index
    %c0_0 = arith.constant 0 : index
    %c0_1 = arith.constant 0 : index
    %0 = vector.load %arg1[%c0, %c0_0, %c0_1] : memref<1x32x32xbf16, #tpu.memory_space<vmem>>, vector<1x32x32xbf16>
    %1 = vector.shape_cast %0 : vector<1x32x32xbf16> to vector<32x32xbf16>
    %2 = arith.extf %1 : vector<32x32xbf16> to vector<32x32xf32>
    %cst = arith.constant dense<0.000000e+00> : vector<32xf32>
    %3 = vector.multi_reduction <add>, %2, %cst [1] : vector<32x32xf32> to vector<32xf32>
    %4 = vector.shape_cast %3 : vector<32xf32> to vector<32x1xf32>
    %5 = arith.truncf %4 : vector<32x1xf32> to vector<32x1xbf16>
    %cst_2 = arith.constant 1.000000e+00 : bf16
    %6 = vector.broadcast %cst_2 : bf16 to vector<32x1xbf16>
    %7 = arith.subf %5, %6 : vector<32x1xbf16>
    %8 = arith.extf %7 : vector<32x1xbf16> to vector<32x1xf32>
    %9 = vector.shape_cast %8 : vector<32x1xf32> to vector<1x32x1xf32>
    %cst_3 = arith.constant dense<0.000000e+00> : vector<1xf32>
    %10 = vector.multi_reduction <add>, %9, %cst_3 [1, 2] : vector<1x32x1xf32> to vector<1xf32>
    %11 = vector.shape_cast %10 : vector<1xf32> to vector<1x1x1xf32>
    %12 = vector.extract %11[0, 0, 0] : f32 from vector<1x1x1xf32>
    %13 = tpu.iota {dimensions = array<i32: 1>} : vector<1x128xi32>
    %c0_i32 = arith.constant 0 : i32
    %14 = vector.broadcast %c0_i32 : i32 to vector<1x128xi32>
    %15 = arith.cmpi eq, %13, %14 : vector<1x128xi32>
    %cst_4 = arith.constant 0.000000e+00 : f32
    %16 = vector.broadcast %12 : f32 to vector<1x128xf32>
    %17 = vector.broadcast %cst_4 : f32 to vector<1x128xf32>
    %18 = arith.select %15, %16, %17 : vector<1x128xi1>, vector<1x128xf32>
    %cst_5 = arith.constant dense<0.000000e+00> : vector<32x1xf32>
    %19 = tpu.matmul %1, %7, %cst_5 {dimension_numbers = #tpu.dot_dimension_numbers<[1], [0], [0], [1], [0, 0, 1, 1], [], []>} : vector<32x32xbf16>, vector<32x1xbf16>, vector<32x1xf32> -> vector<32x1xf32>
    %c0_6 = arith.constant 0 : index
    %c0_7 = arith.constant 0 : index
    %c0_8 = arith.constant 0 : index
    %20 = vector.load %arg5[%c0_6, %c0_7, %c0_8] : memref<4x2x128xf32, #tpu.memory_space<vmem>>, vector<1x2x128xf32>
    %21 = vector.shape_cast %20 : vector<1x2x128xf32> to vector<2x128xf32>
    %c0_9 = arith.constant 0 : index
    %c0_10 = arith.constant 0 : index
    %22 = vector.load %arg2[%c0_9, %c0_10] : memref<1x128xf32, #tpu.memory_space<vmem>>, vector<1x128xf32>
    %23 = vector.broadcast %19 : vector<32x1xf32> to vector<32x128xf32>
    %24 = vector.broadcast %22 : vector<1x128xf32> to vector<32x128xf32>
    %25 = arith.mulf %23, %24 : vector<32x128xf32>
    %26 = vector.extract_strided_slice %21 {offsets = [0, 0], sizes = [1, 128], strides = [1, 1]} : vector<2x128xf32> to vector<1x128xf32>
    %27 = vector.broadcast %26 : vector<1x128xf32> to vector<32x128xf32>
    %28 = arith.addf %25, %27 : vector<32x128xf32>
    %cst_11 = arith.constant 0.000000e+00 : f32
    %29 = vector.broadcast %cst_11 : f32 to vector<32x128xf32>
    %30 = arith.maximumf %28, %29 : vector<32x128xf32>
    %31 = arith.truncf %30 : vector<32x128xf32> to vector<32x128xbf16>
    %c0_12 = arith.constant 0 : index
    %c0_13 = arith.constant 0 : index
    %c0_14 = arith.constant 0 : index
    %32 = vector.load %arg4[%c0_12, %c0_13, %c0_14] : memref<4x128x128xbf16, #tpu.memory_space<vmem>>, vector<1x128x128xbf16>
    %33 = vector.shape_cast %32 : vector<1x128x128xbf16> to vector<128x128xbf16>
    %cst_15 = arith.constant dense<0.000000e+00> : vector<32x128xf32>
    %34 = tpu.matmul %31, %33, %cst_15 {dimension_numbers = #tpu.dot_dimension_numbers<[1], [0], [0], [1], [0, 0, 1, 1], [], []>} : vector<32x128xbf16>, vector<128x128xbf16>, vector<32x128xf32> -> vector<32x128xf32>
    %35 = vector.extract_strided_slice %21 {offsets = [1, 0], sizes = [1, 128], strides = [1, 1]} : vector<2x128xf32> to vector<1x128xf32>
    %36 = vector.broadcast %35 : vector<1x128xf32> to vector<32x128xf32>
    %37 = arith.addf %34, %36 : vector<32x128xf32>
    %cst_16 = arith.constant 0.000000e+00 : f32
    %38 = vector.broadcast %cst_16 : f32 to vector<32x128xf32>
    %39 = arith.maximumf %37, %38 : vector<32x128xf32>
    %cst_17 = arith.constant dense<0.000000e+00> : vector<128xf32>
    %40 = vector.multi_reduction <add>, %39, %cst_17 [0] : vector<32x128xf32> to vector<128xf32>
    %41 = vector.shape_cast %40 : vector<128xf32> to vector<1x128xf32>
    %42 = arith.truncf %39 : vector<32x128xf32> to vector<32x128xbf16>
    %c1 = arith.constant 1 : index
    %c0_18 = arith.constant 0 : index
    %c0_19 = arith.constant 0 : index
    %43 = vector.load %arg5[%c1, %c0_18, %c0_19] : memref<4x2x128xf32, #tpu.memory_space<vmem>>, vector<1x2x128xf32>
    %44 = vector.shape_cast %43 : vector<1x2x128xf32> to vector<2x128xf32>
    %cst_20 = arith.constant dense<0.000000e+00> : vector<32x128xf32>
    %45 = tpu.matmul %1, %42, %cst_20 {dimension_numbers = #tpu.dot_dimension_numbers<[1], [0], [0], [1], [0, 0, 1, 1], [], []>} : vector<32x32xbf16>, vector<32x128xbf16>, vector<32x128xf32> -> vector<32x128xf32>
    %46 = arith.truncf %45 : vector<32x128xf32> to vector<32x128xbf16>
    %c0_21 = arith.constant 0 : index
    %c0_22 = arith.constant 0 : index
    %c0_23 = arith.constant 0 : index
    %47 = vector.load %arg3[%c0_21, %c0_22, %c0_23] : memref<3x128x128xbf16, #tpu.memory_space<vmem>>, vector<1x128x128xbf16>
    %48 = vector.shape_cast %47 : vector<1x128x128xbf16> to vector<128x128xbf16>
    %cst_24 = arith.constant dense<0.000000e+00> : vector<32x128xf32>
    %49 = tpu.matmul %46, %48, %cst_24 {dimension_numbers = #tpu.dot_dimension_numbers<[1], [0], [0], [1], [0, 0, 1, 1], [], []>} : vector<32x128xbf16>, vector<128x128xbf16>, vector<32x128xf32> -> vector<32x128xf32>
    %50 = vector.extract_strided_slice %44 {offsets = [0, 0], sizes = [1, 128], strides = [1, 1]} : vector<2x128xf32> to vector<1x128xf32>
    %51 = vector.broadcast %50 : vector<1x128xf32> to vector<32x128xf32>
    %52 = arith.addf %49, %51 : vector<32x128xf32>
    %cst_25 = arith.constant 0.000000e+00 : f32
    %53 = vector.broadcast %cst_25 : f32 to vector<32x128xf32>
    %54 = arith.maximumf %52, %53 : vector<32x128xf32>
    %55 = arith.truncf %54 : vector<32x128xf32> to vector<32x128xbf16>
    %c1_26 = arith.constant 1 : index
    %c0_27 = arith.constant 0 : index
    %c0_28 = arith.constant 0 : index
    %56 = vector.load %arg4[%c1_26, %c0_27, %c0_28] : memref<4x128x128xbf16, #tpu.memory_space<vmem>>, vector<1x128x128xbf16>
    %57 = vector.shape_cast %56 : vector<1x128x128xbf16> to vector<128x128xbf16>
    %cst_29 = arith.constant dense<0.000000e+00> : vector<32x128xf32>
    %58 = tpu.matmul %55, %57, %cst_29 {dimension_numbers = #tpu.dot_dimension_numbers<[1], [0], [0], [1], [0, 0, 1, 1], [], []>} : vector<32x128xbf16>, vector<128x128xbf16>, vector<32x128xf32> -> vector<32x128xf32>
    %59 = vector.extract_strided_slice %44 {offsets = [1, 0], sizes = [1, 128], strides = [1, 1]} : vector<2x128xf32> to vector<1x128xf32>
    %60 = vector.broadcast %59 : vector<1x128xf32> to vector<32x128xf32>
    %61 = arith.addf %58, %60 : vector<32x128xf32>
    %cst_30 = arith.constant 0.000000e+00 : f32
    %62 = vector.broadcast %cst_30 : f32 to vector<32x128xf32>
    %63 = arith.maximumf %61, %62 : vector<32x128xf32>
    %cst_31 = arith.constant dense<0.000000e+00> : vector<128xf32>
    %64 = vector.multi_reduction <add>, %63, %cst_31 [0] : vector<32x128xf32> to vector<128xf32>
    %65 = vector.shape_cast %64 : vector<128xf32> to vector<1x128xf32>
    %66 = arith.truncf %63 : vector<32x128xf32> to vector<32x128xbf16>
    %c2 = arith.constant 2 : index
    %c0_32 = arith.constant 0 : index
    %c0_33 = arith.constant 0 : index
    %67 = vector.load %arg5[%c2, %c0_32, %c0_33] : memref<4x2x128xf32, #tpu.memory_space<vmem>>, vector<1x2x128xf32>
    %68 = vector.shape_cast %67 : vector<1x2x128xf32> to vector<2x128xf32>
    %cst_34 = arith.constant dense<0.000000e+00> : vector<32x128xf32>
    %69 = tpu.matmul %1, %66, %cst_34 {dimension_numbers = #tpu.dot_dimension_numbers<[1], [0], [0], [1], [0, 0, 1, 1], [], []>} : vector<32x32xbf16>, vector<32x128xbf16>, vector<32x128xf32> -> vector<32x128xf32>
    %70 = arith.truncf %69 : vector<32x128xf32> to vector<32x128xbf16>
    %c1_35 = arith.constant 1 : index
    %c0_36 = arith.constant 0 : index
    %c0_37 = arith.constant 0 : index
    %71 = vector.load %arg3[%c1_35, %c0_36, %c0_37] : memref<3x128x128xbf16, #tpu.memory_space<vmem>>, vector<1x128x128xbf16>
    %72 = vector.shape_cast %71 : vector<1x128x128xbf16> to vector<128x128xbf16>
    %cst_38 = arith.constant dense<0.000000e+00> : vector<32x128xf32>
    %73 = tpu.matmul %70, %72, %cst_38 {dimension_numbers = #tpu.dot_dimension_numbers<[1], [0], [0], [1], [0, 0, 1, 1], [], []>} : vector<32x128xbf16>, vector<128x128xbf16>, vector<32x128xf32> -> vector<32x128xf32>
    %74 = vector.extract_strided_slice %68 {offsets = [0, 0], sizes = [1, 128], strides = [1, 1]} : vector<2x128xf32> to vector<1x128xf32>
    %75 = vector.broadcast %74 : vector<1x128xf32> to vector<32x128xf32>
    %76 = arith.addf %73, %75 : vector<32x128xf32>
    %cst_39 = arith.constant 0.000000e+00 : f32
    %77 = vector.broadcast %cst_39 : f32 to vector<32x128xf32>
    %78 = arith.maximumf %76, %77 : vector<32x128xf32>
    %79 = arith.truncf %78 : vector<32x128xf32> to vector<32x128xbf16>
    %c2_40 = arith.constant 2 : index
    %c0_41 = arith.constant 0 : index
    %c0_42 = arith.constant 0 : index
    %80 = vector.load %arg4[%c2_40, %c0_41, %c0_42] : memref<4x128x128xbf16, #tpu.memory_space<vmem>>, vector<1x128x128xbf16>
    %81 = vector.shape_cast %80 : vector<1x128x128xbf16> to vector<128x128xbf16>
    %cst_43 = arith.constant dense<0.000000e+00> : vector<32x128xf32>
    %82 = tpu.matmul %79, %81, %cst_43 {dimension_numbers = #tpu.dot_dimension_numbers<[1], [0], [0], [1], [0, 0, 1, 1], [], []>} : vector<32x128xbf16>, vector<128x128xbf16>, vector<32x128xf32> -> vector<32x128xf32>
    %83 = vector.extract_strided_slice %68 {offsets = [1, 0], sizes = [1, 128], strides = [1, 1]} : vector<2x128xf32> to vector<1x128xf32>
    %84 = vector.broadcast %83 : vector<1x128xf32> to vector<32x128xf32>
    %85 = arith.addf %82, %84 : vector<32x128xf32>
    %cst_44 = arith.constant 0.000000e+00 : f32
    %86 = vector.broadcast %cst_44 : f32 to vector<32x128xf32>
    %87 = arith.maximumf %85, %86 : vector<32x128xf32>
    %cst_45 = arith.constant dense<0.000000e+00> : vector<128xf32>
    %88 = vector.multi_reduction <add>, %87, %cst_45 [0] : vector<32x128xf32> to vector<128xf32>
    %89 = vector.shape_cast %88 : vector<128xf32> to vector<1x128xf32>
    %90 = arith.truncf %87 : vector<32x128xf32> to vector<32x128xbf16>
    %c3 = arith.constant 3 : index
    %c0_46 = arith.constant 0 : index
    %c0_47 = arith.constant 0 : index
    %91 = vector.load %arg5[%c3, %c0_46, %c0_47] : memref<4x2x128xf32, #tpu.memory_space<vmem>>, vector<1x2x128xf32>
    %92 = vector.shape_cast %91 : vector<1x2x128xf32> to vector<2x128xf32>
    %cst_48 = arith.constant dense<0.000000e+00> : vector<32x128xf32>
    %93 = tpu.matmul %1, %90, %cst_48 {dimension_numbers = #tpu.dot_dimension_numbers<[1], [0], [0], [1], [0, 0, 1, 1], [], []>} : vector<32x32xbf16>, vector<32x128xbf16>, vector<32x128xf32> -> vector<32x128xf32>
    %94 = arith.truncf %93 : vector<32x128xf32> to vector<32x128xbf16>
    %c2_49 = arith.constant 2 : index
    %c0_50 = arith.constant 0 : index
    %c0_51 = arith.constant 0 : index
    %95 = vector.load %arg3[%c2_49, %c0_50, %c0_51] : memref<3x128x128xbf16, #tpu.memory_space<vmem>>, vector<1x128x128xbf16>
    %96 = vector.shape_cast %95 : vector<1x128x128xbf16> to vector<128x128xbf16>
    %cst_52 = arith.constant dense<0.000000e+00> : vector<32x128xf32>
    %97 = tpu.matmul %94, %96, %cst_52 {dimension_numbers = #tpu.dot_dimension_numbers<[1], [0], [0], [1], [0, 0, 1, 1], [], []>} : vector<32x128xbf16>, vector<128x128xbf16>, vector<32x128xf32> -> vector<32x128xf32>
    %98 = vector.extract_strided_slice %92 {offsets = [0, 0], sizes = [1, 128], strides = [1, 1]} : vector<2x128xf32> to vector<1x128xf32>
    %99 = vector.broadcast %98 : vector<1x128xf32> to vector<32x128xf32>
    %100 = arith.addf %97, %99 : vector<32x128xf32>
    %cst_53 = arith.constant 0.000000e+00 : f32
    %101 = vector.broadcast %cst_53 : f32 to vector<32x128xf32>
    %102 = arith.maximumf %100, %101 : vector<32x128xf32>
    %103 = arith.truncf %102 : vector<32x128xf32> to vector<32x128xbf16>
    %c3_54 = arith.constant 3 : index
    %c0_55 = arith.constant 0 : index
    %c0_56 = arith.constant 0 : index
    %104 = vector.load %arg4[%c3_54, %c0_55, %c0_56] : memref<4x128x128xbf16, #tpu.memory_space<vmem>>, vector<1x128x128xbf16>
    %105 = vector.shape_cast %104 : vector<1x128x128xbf16> to vector<128x128xbf16>
    %cst_57 = arith.constant dense<0.000000e+00> : vector<32x128xf32>
    %106 = tpu.matmul %103, %105, %cst_57 {dimension_numbers = #tpu.dot_dimension_numbers<[1], [0], [0], [1], [0, 0, 1, 1], [], []>} : vector<32x128xbf16>, vector<128x128xbf16>, vector<32x128xf32> -> vector<32x128xf32>
    %107 = vector.extract_strided_slice %92 {offsets = [1, 0], sizes = [1, 128], strides = [1, 1]} : vector<2x128xf32> to vector<1x128xf32>
    %108 = vector.broadcast %107 : vector<1x128xf32> to vector<32x128xf32>
    %109 = arith.addf %106, %108 : vector<32x128xf32>
    %cst_58 = arith.constant 0.000000e+00 : f32
    %110 = vector.broadcast %cst_58 : f32 to vector<32x128xf32>
    %111 = arith.maximumf %109, %110 : vector<32x128xf32>
    %cst_59 = arith.constant dense<0.000000e+00> : vector<128xf32>
    %112 = vector.multi_reduction <add>, %111, %cst_59 [0] : vector<32x128xf32> to vector<128xf32>
    %113 = vector.shape_cast %112 : vector<128xf32> to vector<1x128xf32>
    %114 = tpu.concatenate %18, %41, %65, %89, %113 in 1 : vector<1x128xf32>, vector<1x128xf32>, vector<1x128xf32>, vector<1x128xf32>, vector<1x128xf32> -> vector<1x640xf32>
    %115 = arith.truncf %114 : vector<1x640xf32> to vector<1x640xbf16>
    %c0_60 = arith.constant 0 : index
    %c0_61 = arith.constant 0 : index
    %116 = vector.load %arg6[%c0_60, %c0_61] : memref<640x128xbf16, #tpu.memory_space<vmem>>, vector<640x128xbf16>
    %cst_62 = arith.constant dense<0.000000e+00> : vector<1x128xf32>
    %117 = tpu.matmul %115, %116, %cst_62 {dimension_numbers = #tpu.dot_dimension_numbers<[1], [0], [0], [1], [0, 0, 1, 1], [], []>} : vector<1x640xbf16>, vector<640x128xbf16>, vector<1x128xf32> -> vector<1x128xf32>
    %cst_63 = arith.constant 0.00104166672 : f32
    %118 = vector.broadcast %cst_63 : f32 to vector<1x128xf32>
    %119 = arith.mulf %117, %118 : vector<1x128xf32>
    %c0_64 = arith.constant 0 : index
    %c0_65 = arith.constant 0 : index
    %120 = vector.load %arg7[%c0_64, %c0_65] : memref<1x128xf32, #tpu.memory_space<vmem>>, vector<1x128xf32>
    %121 = arith.addf %119, %120 : vector<1x128xf32>
    %cst_66 = arith.constant 5.000000e-01 : f32
    %122 = vector.broadcast %cst_66 : f32 to vector<1x128xf32>
    %123 = arith.addf %121, %122 : vector<1x128xf32>
    %cst_67 = arith.constant 0.000000e+00 : f32
    %cst_68 = arith.constant 1.000000e+00 : f32
    %124 = vector.broadcast %cst_67 : f32 to vector<1x128xf32>
    %125 = arith.maximumf %124, %123 : vector<1x128xf32>
    %126 = vector.broadcast %cst_68 : f32 to vector<1x128xf32>
    %127 = arith.minimumf %126, %125 : vector<1x128xf32>
    %c0_69 = arith.constant 0 : index
    %c0_70 = arith.constant 0 : index
    %c0_71 = arith.constant 0 : index
    %128 = vector.load %arg8[%c0_69, %c0_70, %c0_71] : memref<1x1x128xf32, #tpu.memory_space<vmem>>, vector<1x1x128xf32>
    %129 = vector.shape_cast %128 : vector<1x1x128xf32> to vector<1x128xf32>
    %130 = vector.shape_cast %127 : vector<1x128xf32> to vector<1x1x128xf32>
    tpu.vector_store %arg8[%c0_69, %c0_70, %c0_71], %130 {strides = array<i32>} : memref<1x1x128xf32, #tpu.memory_space<vmem>>, vector<1x1x128xf32>,
    return
  }
  func.func @transform_0(%arg0: i32) -> (i32, i32, i32) {
    %c0_i32 = arith.constant 0 : i32
    %c0_i32_0 = arith.constant 0 : i32
    %c0_i32_1 = arith.constant 0 : i32
    return %arg0, %c0_i32, %c0_i32_0 : i32, i32, i32
  }
  func.func @transform_1(%arg0: i32) -> (i32, i32) {
    %c0_i32 = arith.constant 0 : i32
    %c0_i32_0 = arith.constant 0 : i32
    %c0_i32_1 = arith.constant 0 : i32
    return %c0_i32, %c0_i32_0 : i32, i32
  }
  func.func @transform_2(%arg0: i32) -> (i32, i32, i32) {
    %c0_i32 = arith.constant 0 : i32
    %c0_i32_0 = arith.constant 0 : i32
    %c0_i32_1 = arith.constant 0 : i32
    %c0_i32_2 = arith.constant 0 : i32
    return %c0_i32, %c0_i32_0, %c0_i32_1 : i32, i32, i32
  }
  func.func @transform_3(%arg0: i32) -> (i32, i32, i32) {
    %c0_i32 = arith.constant 0 : i32
    %c0_i32_0 = arith.constant 0 : i32
    %c0_i32_1 = arith.constant 0 : i32
    %c0_i32_2 = arith.constant 0 : i32
    return %c0_i32, %c0_i32_0, %c0_i32_1 : i32, i32, i32
  }
  func.func @transform_4(%arg0: i32) -> (i32, i32, i32) {
    %c0_i32 = arith.constant 0 : i32
    %c0_i32_0 = arith.constant 0 : i32
    %c0_i32_1 = arith.constant 0 : i32
    %c0_i32_2 = arith.constant 0 : i32
    return %c0_i32, %c0_i32_0, %c0_i32_1 : i32, i32, i32
  }
  func.func @transform_5(%arg0: i32) -> (i32, i32) {
    %c0_i32 = arith.constant 0 : i32
    %c0_i32_0 = arith.constant 0 : i32
    %c0_i32_1 = arith.constant 0 : i32
    return %c0_i32, %c0_i32_0 : i32, i32
  }
  func.func @transform_6(%arg0: i32) -> (i32, i32) {
    %c0_i32 = arith.constant 0 : i32
    %c0_i32_0 = arith.constant 0 : i32
    %c0_i32_1 = arith.constant 0 : i32
    return %c0_i32, %c0_i32_0 : i32, i32
  }
  func.func @transform_7(%arg0: i32) -> (i32, i32, i32) {
    %c0_i32 = arith.constant 0 : i32
    %c0_i32_0 = arith.constant 0 : i32
    %c0_i32_1 = arith.constant 0 : i32
    return %arg0, %c0_i32, %c0_i32_0 : i32, i32, i32
  }
}

</mosaic_0001>

<bundles_post_ra>
// kernel: tpu_custom_call.1
= control target key start
LH: loop header
LB: loop body
LE: loop exit
PB: predicated region body
PF: predicated region fallthrough
CT: control target
= control target key end

     0   :  { %12 = vsyncpa [#allocation3], 0  ;;  %s3368_s0 = inlined_call_operand.hbm [shape: bf16[2,32,32], index: 0, kind: input, shape index: {}]   ;;  %s3369_s1 = inlined_call_operand.vmem [shape: f32[1,128], index: 1, kind: input, shape index: {}]   ;;  %s3370_s2 = inlined_call_operand.hbm [shape: bf16[3,128,128], index: 2, kind: input, shape index: {}]   ;;  %s3371_s3 = inlined_call_operand.hbm [shape: bf16[4,128,128], index: 3, kind: input, shape index: {}]   ;;  %s3372_s4 = inlined_call_operand.vmem [shape: f32[4,2,128], index: 4, kind: input, shape index: {}]   ;;  %s3373_s5 = inlined_call_operand.hbm [shape: bf16[640,128], index: 5, kind: input, shape index: {}]   ;;  %s3374_s6 = inlined_call_operand.vmem [shape: f32[1,128], index: 6, kind: input, shape index: {}]   ;;  %s3375_s7 = inlined_call_operand.hbm [shape: f32[2,1,128], index: 7, kind: output, shape index: {}]  }
   0x1   :  { %14 = vsyncpa [#allocation3 + $0x1], 0 }
   0x2   :  { %15 = vsyncpa [#allocation6], 0 }
   0x3   :  { %16 = vsyncpa [#allocation9], 0 }
   0x4   :  { %17 = vsyncpa [#allocation4], 0 }
   0x5   :  { %19 = vsyncpa [#allocation4 + $0x1], 0  ;;  %s3013_s24 = smov 0   ;;  %s3015_s25 = smov 0  }
   0x6   :  { %s3017_s26 = smov 0   ;;  %s3019_s27 = smov 0  }
   0x7 LB: > { %s3034_s28 = sadd.s32 4294967295, %s2960_s27   ;;  %s2123_s29 = sadd.s32 4294967294, %s2960_s27   ;;  %s2960_s27 = sphi %s3019_s27, %s3401_s27   ;;  %s2956_s26 = sphi %s3017_s26, %s3400_s26   ;;  %s2952_s25 = sphi %s3015_s25, %s3399_s25   ;;  %s2948_s24 = sphi %s3013_s24, %s3398_s24  }
   0x8   : > { %p45_p0 = scmp.ne.s32.totalorder %s2952_s25, %s2948_s24  ;;  %p3376_p1 = scmp.eq.s32.totalorder %s3034_s28, 0 }
   0x9   : > { %p201_p3 = scmp.eq.s32.totalorder %s2123_s29, 1  ;;  %p2124_p5 = scmp.ge.s32.totalorder %s2960_s27, 1 }
   0xa   : > { %p3043_p4 = por %p3376_p1, %p45_p0  ;;  %p208_p7 = scmp.lt.s32.totalorder %s2960_s27, 3 }
   0xb   : > { %p3048_p6 = por %p201_p3, %p45_p0  ;;  %s2962_s10 = smov [#allocation5]  }
   0xc   : > { %s3380_s30 = scalar_select %p3043_p4, 1, 0 }
   0xd   : > { %s3381_s8 = scalar_select %p3048_p6, 1, 0 }
   0xe   : > { %p3053_p8 = pnand %p2124_p5, %p208_p7  ;;  %s223_s11 = sshll.u32 %s2962_s10, 4  ;;  %s3057_s11 = int_to_ptr.vmem [resolvable:$true] %s223_s11 }
   0xf   : > { %3382 = sst [smem:[#allocation15_spill]] %s3381_s8  ;;  %s2963_s13 = smov [#allocation7]  }
  0x10   : > { %s3383_s9 = scalar_select %p3053_p8, 1, 0 }
  0x11   : > { %p2603_p9 = pneg %p3053_p8  ;;  %s236_s14 = sshll.u32 %s2963_s13, 4  ;;  %s3068_s14 = int_to_ptr.vmem [resolvable:$true] %s236_s14 }
  0x12   : > { %s2964_s15 = smov [#allocation8]   ;;  %s2772_s19 = scalar_lea.hbm %s3370_s2, 3072 }
  0x13   : > { %p3064_p11 = pnand %p2603_p9, %p3376_p1  ;;  %s3070_s16 = sshll.u32 %s2964_s15, 4  ;;  %s253_s16 = int_to_ptr.vmem [resolvable:$true] %s3070_s16 }
  0x14   : > { %p2773_p12 = scmp.ne.s32.totalorder %s3370_s2, %s2772_s19  ;;  %p2779_p5 = scmp.lt.u32.totalorder %s2772_s19, %s3370_s2 }
  0x15   : > { %p3080_p13 = pneg %p3064_p11 }
  0x17   : > { %p2775_p0 = pnand %p3080_p13, %p2773_p12 }
  0x19   : > { %p2776_p3 = pneg %p2775_p0 }
  0x1b   : > { %p2781_p7 = pnand %p2779_p5, %p2776_p3 }
  0x1d   : > { %2784 = shalt.err (!%p2781_p7)
}
  0x1e   : > { %s2785_s10 = scalar_lea.vmem %s3057_s11, 3072  ;;  %p2793_p2 = scmp.lt.s32.totalorder %s3057_s11, %s3057_s11 }
  0x1f   : > { %p2786_p9 = scmp.ne.s32.totalorder %s3057_s11, %s2785_s10  ;;  %p2794_p6 = scmp.lt.s32.totalorder %s2785_s10, %s2785_s10 }
  0x21   : > { %p2788_p10 = pnand %p2786_p9, %p3080_p13  ;;  %p2795_p12 = por %p2794_p6, %p2793_p2 }
  0x23   : > { %p2789_p1 = pneg %p2788_p10 }
  0x25   : > { %p2796_p0 = pnand %p2795_p12, %p2789_p1 }
  0x27   : > { %2799 = shalt.err (!%p2796_p0)
}
  0x28   : > { %s2965_s13 = smov 64   ;;  %s2966_s15 = smov 4  }
  0x29   : > { %2606 = dma.hbm_to_vmem [thread:$0]  (!%p3064_p11), %s3370_s2, 3072, %s3057_s11, [#allocation6], %s2965_s13, %s2965_s13, %s2966_s15  }
  0x2a   : > { %s2800_s21 = scalar_lea.hbm %s3371_s3, 4096 }
  0x2b   : > { %p2801_p1 = scmp.ne.s32.totalorder %s3371_s3, %s2800_s21  ;;  %p2807_p10 = scmp.lt.u32.totalorder %s2800_s21, %s3371_s3 }
  0x2d   : > { %p2803_p2 = pnand %p2801_p1, %p3080_p13 }
  0x2f   : > { %p2804_p6 = pneg %p2803_p2 }
  0x31   : > { %p2809_p3 = pnand %p2807_p10, %p2804_p6 }
  0x33   : > { %2812 = shalt.err (!%p2809_p3)
}
  0x34   : > { %s2813_s11 = scalar_lea.vmem %s3068_s14, 4096  ;;  %p2821_p12 = scmp.lt.s32.totalorder %s3068_s14, %s3068_s14 }
  0x35   : > { %p2814_p5 = scmp.ne.s32.totalorder %s3068_s14, %s2813_s11  ;;  %p2822_p0 = scmp.lt.s32.totalorder %s2813_s11, %s2813_s11 }
  0x37   : > { %p2816_p7 = pnand %p2814_p5, %p3080_p13  ;;  %p2823_p1 = por %p2822_p0, %p2821_p12 }
  0x39   : > { %p2817_p9 = pneg %p2816_p7 }
  0x3b   : > { %p2824_p2 = pnand %p2823_p1, %p2817_p9 }
  0x3d   : > { %2827 = shalt.err (!%p2824_p2)
}
  0x3e   : > { %2609 = dma.hbm_to_vmem [thread:$0]  (!%p3064_p11), %s3371_s3, 4096, %s3068_s14, [#allocation6], %s2965_s13, %s2965_s13, %s2966_s15  }
  0x3f   : > { %s2828_s20 = scalar_lea.hbm %s3373_s5, 5120 }
  0x40   : > { %p2829_p6 = scmp.ne.s32.totalorder %s3373_s5, %s2828_s20  ;;  %p2835_p5 = scmp.lt.u32.totalorder %s2828_s20, %s3373_s5 }
  0x42   : > { %p2831_p10 = pnand %p2829_p6, %p3080_p13 }
  0x44   : > { %p2832_p3 = pneg %p2831_p10 }
  0x46   : > { %p2837_p7 = pnand %p2835_p5, %p2832_p3 }
  0x48   : > { %2840 = shalt.err (!%p2837_p7)
}
  0x49   : > { %s2841_s11 = scalar_lea.vmem %s253_s16, 5120  ;;  %p2849_p1 = scmp.lt.s32.totalorder %s253_s16, %s253_s16 }
  0x4a   : > { %p2842_p9 = scmp.ne.s32.totalorder %s253_s16, %s2841_s11  ;;  %p2850_p2 = scmp.lt.s32.totalorder %s2841_s11, %s2841_s11 }
  0x4c   : > { %p2844_p12 = pnand %p2842_p9, %p3080_p13  ;;  %p2851_p4 = por %p2850_p2, %p2849_p1 }
  0x4e   : > { %p2845_p0 = pneg %p2844_p12 }
  0x50   : > { %p2852_p8 = pnand %p2851_p4, %p2845_p0 }
  0x52   : > { %2855 = shalt.err (!%p2852_p8)
}
  0x53   : > { %2612 = dma.hbm_to_vmem [thread:$0]  (!%p3064_p11), %s3373_s5, 5120, %s253_s16, [#allocation9], %s2965_s13, %s2965_s13, %s2966_s15  }
  0x54   : > { %s3153_s22 = sadd.s32 1, %s2960_s27   ;;  %s32_s17 = sadd.s32 1, %s2956_s26 }
  0x55   : > { %s29_s12 = ssub.s32 %s2960_s27, %s3153_s22  ;;  %p39_p8 = scmp.ne.s32.totalorder %s2956_s26, %s2952_s25 }
  0x56   : > { %p30_p4 = scmp.eq.s32.totalorder %s29_s12, 0  ;;  %p40_p13 = scmp.eq.s32.totalorder %s2960_s27, 0 }
  0x57   : > { %p2624_p6 = scmp.lt.s32.totalorder %s2960_s27, 2  ;;  %p3386_p3 = scmp.eq.s32.totalorder %s3034_s28, 1 }
  0x58   : > { %s3163_s18 = scalar_select %p30_p4, %s2956_s26, %s32_s17  }
  0x59   : > { %p41_p10 = por %p40_p13, %p39_p8  ;;  %p3167_p5 = por %p3386_p3, %p39_p8 }
  0x5a   : > { %s269_s20 = sand.u32 1, %s2956_s26   ;;  %s2253_s21 = sshll.u32 %s2960_s27, 8 }
  0x5b   : > { %s2129_s16 = sshll.u32 %s269_s20, 4  ;;  %s3176_s10 = scalar_lea.hbm %s3368_s0, %s2253_s21 }
  0x5c   : > { %s273_s11 = scalar_lea.vmem [#allocation2], %s2129_s16  ;;  %p3178_p11 = pnand %p2624_p6, %p41_p10 }
  0x5d   : > { %s280_s14 = sshll.u32 %s273_s11, 4  ;;  %s3184_s12 = scalar_lea.sflag [#allocation3], %s269_s20  ;;  %s3182_s14 = int_to_ptr.vmem [resolvable:$true] %s280_s14 }
  0x5e   : > { %s2856_s17 = scalar_lea.hbm %s3176_s10, 256  ;;  %p2858_p9 = pneg %p3178_p11 }
  0x5f   : > { %p2857_p7 = scmp.ne.s32.totalorder %s3176_s10, %s2856_s17  ;;  %s2861_s23 = scalar_lea.hbm %s3368_s0, 512 }
  0x60   : > { %p2862_p1 = scmp.lt.u32.totalorder %s3176_s10, %s3368_s0  ;;  %p2863_p2 = scmp.lt.u32.totalorder %s2861_s23, %s2856_s17 }
  0x61   : > { %p2859_p12 = pnand %p2858_p9, %p2857_p7  ;;  %p2865_p8 = scmp.lt.u32.totalorder %s2856_s17, %s3176_s10 }
  0x62   : > { %p2864_p4 = por %p2863_p2, %p2862_p1 }
  0x63   : > { %p2860_p0 = pneg %p2859_p12 }
  0x64   : > { %p2866_p13 = por %p2865_p8, %p2864_p4 }
  0x66   : > { %p2867_p6 = pnand %p2866_p13, %p2860_p0 }
  0x68   : > { %2870 = shalt.err (!%p2867_p6)
}
  0x69   : > { %s2871_s20 = scalar_lea.vmem %s3182_s14, 256  ;;  %s2967_s21 = smov [#allocation2]  }
  0x6a   : > { %p2872_p10 = scmp.ne.s32.totalorder %s3182_s14, %s2871_s20  ;;  %s2876_s16 = sshll.u32 %s2967_s21, 4  ;;  %s2877_s16 = int_to_ptr.vmem [resolvable:$false] %s2876_s16 }
  0x6b   : > { %s2878_s29 = scalar_lea.vmem %s2877_s16, 512  ;;  %p2879_p12 = scmp.lt.s32.totalorder %s3182_s14, %s2877_s16 }
  0x6c   : > { %p2874_p3 = pnand %p2872_p10, %p2858_p9  ;;  %p2880_p1 = scmp.lt.s32.totalorder %s2878_s29, %s2871_s20 }
  0x6e   : > { %p2875_p7 = pneg %p2874_p3  ;;  %p2881_p2 = por %p2880_p1, %p2879_p12 }
  0x70   : > { %p2882_p4 = pnand %p2881_p2, %p2875_p7 }
  0x72   : > { %2885 = shalt.err (!%p2882_p4)
}
  0x73   : > { %2616 = dma.hbm_to_vmem [thread:$0]  (!%p3178_p11), %s3176_s10, 256, %s3182_s14, %s3184_s12, %s2965_s13, %s2965_s13, %s2966_s15  }
  0x74   : > { %p3389_p9 = scmp.ne.s32.totalorder %s3383_s9, 0 }
  0x75   : > { %s3218_s17 = sand.u32 (!%p3389_p9), 1, %s2952_s25   ;;  %p3390_p0 = scmp.ne.s32.totalorder (!%p3389_p9), %s3380_s30, 0 }
  0x76   : > { %292 = sbr.rel (%p3389_p9) target bundleno = 3134 (0xc3e), region = 48  ;;  %s2133_s23 = sshll.u32 (!%p3389_p9), %s3218_s17, 4 }
  0x77   : > { %s295_s11 = scalar_lea.sflag (!%p3389_p9), [#allocation3], %s3218_s17  ;;  %s298_s20 = scalar_lea.vmem (!%p3389_p9), [#allocation2], %s2133_s23 }
  0x7d   : > { %2931 = dma.done.wait (%p3390_p0), %s295_s11, 256  }
  0x7e   : > { %2933 = vsyncadd (%p3390_p0), %s295_s11, 4294967040  ;;  %p3391_p8 = scmp.eq.s32.totalorder %s3034_s28, 0 }
  0x80   : > { %2935 = dma.done.wait (%p3391_p8), [#allocation6], 7168   ;;  %p3392_p11 = pmov %p3391_p8 }
  0x81   : > { %p3393_p13 = pmov %p3391_p8 }
  0x82   : > { %2937 = vsyncadd (%p3392_p11), [#allocation6], 4294960128 }
  0x83   : > { %2939 = dma.done.wait (%p3393_p13), [#allocation9], 5120   ;;  %p3394_p6 = pmov %p3391_p8 }
  0x84   : > { %v3234_v0 = vld [vmem:[%s298_s20 + $0x8] sm:$0xff]   ;;  %vm350_vm0 = vcmask 261120   ;;  %v3236_v1 = vld [vmem:[%s298_s20] sm:$0xff]   ;;  %v2968_v10 = vmov 0   ;;  %v2969_v17 = vmov 1065369472   ;;  %v388_v43 = vlaneseq }
  0x85   : > { %2941 = vsyncadd (%p3394_p6), [#allocation9], 4294962176  ;;  %v348_v2 = vunpack.c.l.bf16 %v3234_v0  ;;  %v346_v3 = vunpack.c.l.bf16 %v3236_v1  ;;  %v349_v4 = vunpack.c.h.bf16 %v3234_v0  ;;  %v347_v5 = vunpack.c.h.bf16 %v3236_v1  ;;  %2397 = vmatprep.mubr.msk.bf16.mxu1 %vm350_vm0, %v3236_v1  ;;  %2671 = vset.pattern.permute.xlu1 %v2968_v10  ;;  %v2674_v31 = vld [vmem:[#allocation7] sm:$0xff]   ;;  %v2675_v32 = vld [vmem:[#allocation7 + $0x8] sm:$0xff]   ;;  %s2250_s20 = sshll.u32 %s3034_s28, 4  ;;  %s339_s30 = scalar_lea.vmem [#allocation10], %s3218_s17 }
  0x86   : > { %2670 = vset.pattern.permute.xlu0 %v2968_v10  ;;  %vm371_vm1 = vcmask 7168   ;;  %v2676_v33 = vld [vmem:[#allocation7 + $0x10] sm:$0xff]   ;;  %v2677_v34 = vld [vmem:[#allocation7 + $0x18] sm:$0xff]   ;;  %v2678_v35 = vld [vmem:[#allocation7 + $0x20] sm:$0xff]   ;;  %v491_v44 = vshrl.u32 %v388_v43, 7  ;;  %vm2971_vm4 = vmmov 0   ;;  %s3324_s10 = scalar_lea.hbm %s3375_s7, %s2250_s20 }
  0x87   : > { %v357_v6 = vsel %vm350_vm0, %v348_v2, 0.0  ;;  %v351_v7 = vsel %vm350_vm0, %v346_v3, 0.0  ;;  %v360_v8 = vsel %vm350_vm0, %v349_v4, 0.0  ;;  %v354_v9 = vsel %vm350_vm0, %v347_v5, 0.0  ;;  %v2679_v40 = vld [vmem:[#allocation7 + $0x28] sm:$0xff]   ;;  %v2680_v41 = vld [vmem:[#allocation7 + $0x30] sm:$0xff]  }
  0x88   : > { %358 = vadd.xlane.f32.xlu1 %v357_v6  ;;  %352 = vadd.xlane.f32.xlu0 %v351_v7  ;;  %v2681_v42 = vld [vmem:[#allocation7 + $0x38] sm:$0xff]   ;;  %v3251_v45 = vsub.s32 0, %v491_v44  ;;  %v458_v46 = vld [vmem:[%s3372_s4] sm:$0x3]  ;;  %s2028_s9 = sshll.u32 %s339_s30, 4  ;;  %s2016_s14 = scalar_lea.sflag [#allocation4], %s3218_s17  ;;  %s3326_s9 = int_to_ptr.vmem [resolvable:$true] %s2028_s9 }
  0x89   : > { %v2141_v47 = vld [vmem:[%s3369_s1] ss:$0 sm:$0xff]  ;;  %s2886_s8 = scalar_lea.vmem %s3326_s9, 16  ;;  %s2972_s28 = smov [#allocation10]  }
  0x8a   : > { %v493_v49 = vrot.slane %v458_v46, %v3251_v45  ;;  %p2887_p10 = scmp.ne.s32.totalorder %s3326_s9, %s2886_s8  ;;  %s2890_s12 = sshll.u32 %s2972_s28, 4  ;;  %s2891_s12 = int_to_ptr.vmem [resolvable:$false] %s2890_s12 }
  0x8b   : > { %p2893_p12 = scmp.lt.s32.totalorder %s3326_s9, %s2891_s12 }
  0x8c   : > { %361 = vadd.xlane.f32.xlu1 %v360_v8  ;;  %355 = vadd.xlane.f32.xlu0 %v354_v9  ;;  %p2888_p3 = pnand %p2887_p10, %p3167_p5 }
  0x8e   : > { %p2889_p7 = pneg %p2888_p3 }
 0x115   : > { %v359_v11 = vpop.xlane.xlu1 %358  ;;  %v353_v12 = vpop.xlane.xlu0 %352 }
 0x119   : > { %v362_v13 = vpop.xlane.xlu1 %361  ;;  %v356_v14 = vpop.xlane.xlu0 %355 }
 0x11a   : > { %v364_v15 = vpack.c.bf16 %v362_v13, %v359_v11  ;;  %v363_v16 = vpack.c.bf16 %v356_v14, %v353_v12  ;;  %v2682_v12 = vld [vmem:[#allocation5] sm:$0xff]   ;;  %v2683_v13 = vld [vmem:[#allocation5 + $0x8] sm:$0xff]   ;;  %v2684_v14 = vld [vmem:[#allocation5 + $0x10] sm:$0xff]  }
 0x11b   : > { %2429 = vmatprep.subr.bf16.mxu0 %v2682_v12 }
 0x11c   : > { %v366_v18 = vsub.bf16 %v364_v15, %v2969_v17  ;;  %v365_v19 = vsub.bf16 %v363_v16, %v2969_v17  ;;  %2430 = vmatpush3.bf16.msra.mxu0 %v2682_v12  ;;  %v2685_v15 = vld [vmem:[#allocation5 + $0x18] sm:$0xff]   ;;  %v2686_v16 = vld [vmem:[#allocation5 + $0x20] sm:$0xff]   ;;  %v2687_v17 = vld [vmem:[#allocation5 + $0x28] sm:$0xff]  }
 0x11d   : > { %2431 = vmatprep.subr.bf16.mxu0 %v2683_v13 }
 0x11e   : > { %2393 = vmatprep.subr.bf16.mxu1 %v365_v19  ;;  %v367_v20 = vunpack.c.l.bf16 %v365_v19  ;;  %v368_v21 = vunpack.c.h.bf16 %v365_v19  ;;  %v369_v22 = vunpack.c.l.bf16 %v366_v18  ;;  %v370_v23 = vunpack.c.h.bf16 %v366_v18 }
 0x11f   : > { %2394 = vmatpush3.bf16.msra.mxu1 %v365_v19  ;;  %v3262_v19 = vsub.s32 1, %v491_v44  ;;  %v2694_v44 = vld [vmem:[#allocation7 + $0x60] sm:$0xff]  }
 0x120   : > { %2395 = vmatprep.subr.bf16.mxu1 %v366_v18  ;;  %v372_v24 = vsel %vm371_vm1, %v367_v20, 0.0  ;;  %v373_v25 = vsel %vm371_vm1, %v368_v21, 0.0  ;;  %v375_v27 = vsel %vm371_vm1, %v369_v22, 0.0  ;;  %v377_v29 = vsel %vm371_vm1, %v370_v23, 0.0  ;;  %2432 = vmatpush3.bf16.msra.mxu0 %v2683_v13 }
 0x121   : > { %v374_v26 = vadd.f32 %v373_v25, %v372_v24  ;;  %2433 = vmatprep.subr.bf16.mxu0 %v2684_v14  ;;  %v523_v20 = vrot.slane %v458_v46, %v3262_v19  ;;  %v2695_v46 = vld [vmem:[#allocation7 + $0x68] sm:$0xff]  }
 0x123   : > { %2396 = vmatpush3.bf16.msra.mxu1 %v366_v18  ;;  %v376_v28 = vadd.f32 %v375_v27, %v374_v26  ;;  %v2688_v18 = vld [vmem:[#allocation5 + $0x30] sm:$0xff]  }
 0x124   : > { %2401 = vmatprep.subr.bf16.mxu1 %v2674_v31  ;;  %2434 = vmatpush3.bf16.msra.mxu0 %v2684_v14 }
 0x125   : > { %v378_v30 = vadd.f32 %v377_v29, %v376_v28  ;;  %2435 = vmatprep.subr.bf16.mxu0 %v2685_v15 }
 0x126   : > { %2398 = vmatmul.mubr.msk.bf16.vlgmr.msra.gmra.mrb[0].mxu1 %vm350_vm0, %v3234_v0 }
 0x127   : > { %2402 = vmatpush3.bf16.msra.mxu1 %v2674_v31 }
 0x128   : > { %2403 = vmatprep.subr.bf16.mxu1 %v2675_v32  ;;  %2436 = vmatpush3.bf16.msra.mxu0 %v2685_v15 }
 0x129   : > { %2437 = vmatprep.subr.bf16.mxu0 %v2686_v16 }
 0x12b   : > { %2404 = vmatpush3.bf16.msra.mxu1 %v2675_v32 }
 0x12c   : > { %2405 = vmatprep.subr.bf16.mxu1 %v2676_v33  ;;  %2438 = vmatpush3.bf16.msra.mxu0 %v2686_v16 }
 0x12d   : > { %2439 = vmatprep.subr.bf16.mxu0 %v2687_v17 }
 0x12f   : > { %2406 = vmatpush3.bf16.msra.mxu1 %v2676_v33 }
 0x130   : > { %2407 = vmatprep.subr.bf16.mxu1 %v2677_v34  ;;  %2440 = vmatpush3.bf16.msra.mxu0 %v2687_v17 }
 0x131   : > { %2441 = vmatprep.subr.bf16.mxu0 %v2688_v18 }
 0x133   : > { %2408 = vmatpush3.bf16.msra.mxu1 %v2677_v34 }
 0x134   : > { %2409 = vmatprep.subr.bf16.mxu1 %v2678_v35  ;;  %2442 = vmatpush3.bf16.msra.mxu0 %v2688_v18 }
 0x137   : > { %2410 = vmatpush3.bf16.msra.mxu1 %v2678_v35 }
 0x138   : > { %2411 = vmatprep.subr.bf16.mxu1 %v2679_v40 }
 0x13b   : > { %2412 = vmatpush3.bf16.msra.mxu1 %v2679_v40  ;;  %v2691_v40 = vld [vmem:[#allocation7 + $0x48] sm:$0xff]  }
 0x13c   : > { %2413 = vmatprep.subr.bf16.mxu1 %v2680_v41 }
 0x13f   : > { %2414 = vmatpush3.bf16.msra.mxu1 %v2680_v41  ;;  %v2692_v41 = vld [vmem:[#allocation7 + $0x50] sm:$0xff]  }
 0x140   : > { %2415 = vmatprep.subr.bf16.mxu1 %v2681_v42 }
 0x143   : > { %2416 = vmatpush3.bf16.msra.mxu1 %v2681_v42  ;;  %v2693_v42 = vld [vmem:[#allocation7 + $0x58] sm:$0xff]  }
 0x1f9   : > { %v2399_v36 = vpop.f32.mrb[0].mxu1 }
 0x1fa   : > { %472 = vperm.xlu1 %2671, %v2399_v36   ;;  %v443_v37 = vpop.f32.mrb[1].mxu1 }
 0x1fb   : > { %462 = vperm.xlu0 %2670, %v443_v37   ;;  %v2400_v38 = vpop.f32.mrb[2].mxu1 }
 0x1fc   : > { %v446_v39 = vpop.f32.mrb[3].mxu1 }
 0x1fe   : > { %467 = vperm.xlu1 %2671, %v446_v39   ;;  %v2690_v39 = vld [vmem:[#allocation7 + $0x40] sm:$0xff]  }
 0x202   : > { %477 = vperm.xlu1 %2671, %v2400_v38   ;;  %v2689_v38 = vld [vmem:[#allocation5 + $0x38] sm:$0xff]  }
 0x203   : > { %2443 = vmatprep.subr.bf16.mxu0 %v2689_v38 }
 0x204   : > { %2444 = vmatpush3.bf16.msra.mxu0 %v2689_v38  ;;  %v2707_v38 = vld [vmem:[#allocation7 + $0x88] sm:$0xff]  }
 0x226   : > { %379 = vadd.xlane.f32.xlu1 %v378_v30 }
 0x279   : > { %v473_v48 = vpop.permute.xlu1 %472 }
 0x27a   : > { %v463_v50 = vpop.permute.xlu0 %462  ;;  %v488_v53 = vmul.f32 %v2141_v47, %v473_v48 }
 0x27b   : > { %v486_v51 = vmul.f32 %v2141_v47, %v463_v50 }
 0x27c   : > { %v496_v58 = vadd.f32 %v493_v49, %v488_v53  ;;  %v2696_v53 = vld [vmem:[#allocation7 + $0x70] sm:$0xff]  }
 0x27d   : > { %v468_v52 = vpop.permute.xlu1 %467  ;;  %v494_v54 = vadd.f32 %v493_v49, %v486_v51 }
 0x27e   : > { %v487_v55 = vmul.f32 %v2141_v47, %v468_v52  ;;  %v500_v2 = vmax.f32 %v496_v58, 0.0 }
 0x27f   : > { %v498_v59 = vmax.f32 %v494_v54, 0.0  ;;  %v2697_v54 = vld [vmem:[#allocation7 + $0x78] sm:$0xff]  }
 0x280   : > { %v495_v56 = vadd.f32 %v493_v49, %v487_v55  ;;  %v2150_v55 = vld [vmem:[%s3372_s4 + $0x2] sm:$0x3] }
 0x281   : > { %v478_v57 = vpop.permute.xlu1 %477 }
 0x282   : > { %v499_v60 = vmax.f32 %v495_v56, 0.0  ;;  %v489_v61 = vmul.f32 %v2141_v47, %v478_v57  ;;  %v708_v56 = vrot.slane %v2150_v55, %v3251_v45 }
 0x284   : > { %v497_v62 = vadd.f32 %v493_v49, %v489_v61  ;;  %v502_v63 = vpack.c.bf16 %v499_v60, %v498_v59 }
 0x286   : > { %v501_v3 = vmax.f32 %v497_v62, 0.0  ;;  %2417 = vmatprep.mubr.bf16.mxu1 %v502_v63 }
 0x288   : > { %v503_v4 = vpack.c.bf16 %v501_v3, %v500_v2 }
 0x28a   : > { %2418 = vmatmul.mubr.bf16.vlgmr.msra.gmra.mrb[4].mxu1 %v503_v4 }
 0x28b   : > { %2425 = vmatprep.mubr.msk.bf16.mxu1 %vm350_vm0, %v3236_v1 }
 0x2b3   : > { %v380_v5 = vpop.xlane.xlu1 %379 }
 0x2b4   : > { %v381_v6 = vrot.slane %v380_v5, 4 }
 0x2b6   : > { %v382_v7 = vadd.f32 %v381_v6, %v380_v5 }
 0x2b8   : > { %v383_v8 = vrot.slane %v382_v7, 2 }
 0x2ba   : > { %v384_v9 = vadd.f32 %v383_v8, %v382_v7 }
 0x2bc   : > { %v385_v10 = vrot.slane %v384_v9, 1 }
 0x2be   : > { %v386_v11 = vadd.f32 %v385_v10, %v384_v9  ;;  %v832_v9 = vrot.slane %v2150_v55, %v3262_v19 }
 0x2c0   : > { %2585 = vpush %v386_v11 }
 0x2f1   : > { %s2586_s21 = spop %2585 }
 0x35d   : > { %v2419_v21 = vpop.f32.mrb[4].mxu1 }
 0x35e   : > { %v615_v22 = vadd.f32 %v2419_v21, %v523_v20  ;;  %v606_v23 = vpop.f32.mrb[5].mxu1 }
 0x35f   : > { %v607_v24 = vadd.f32 %v606_v23, %v523_v20  ;;  %v2420_v25 = vpop.f32.mrb[6].mxu1 }
 0x360   : > { %v618_v26 = vadd.f32 %v2420_v25, %v523_v20  ;;  %v609_v27 = vpop.f32.mrb[7].mxu1  ;;  %v623_v29 = vmax.f32 %v615_v22, 0.0 }
 0x361   : > { %v610_v28 = vadd.f32 %v609_v27, %v523_v20  ;;  %v621_v31 = vmax.f32 %v607_v24, 0.0 }
 0x362   : > { %v624_v30 = vmax.f32 %v618_v26, 0.0 }
 0x363   : > { %v622_v32 = vmax.f32 %v610_v28, 0.0  ;;  %v2698_v28 = vld [vmem:[#allocation5 + $0x40] sm:$0xff]  }
 0x364   : > { %v635_v33 = vpack.c.bf16 %v624_v30, %v623_v29 }
 0x365   : > { %v625_v34 = vadd.f32 %v622_v32, %v621_v31  ;;  %v634_v35 = vpack.c.bf16 %v622_v32, %v621_v31  ;;  %v2701_v31 = vld [vmem:[#allocation5 + $0x58] sm:$0xff]   ;;  %v2702_v32 = vld [vmem:[#allocation5 + $0x60] sm:$0xff]  }
 0x367   : > { %v626_v36 = vadd.f32 %v625_v34, %v623_v29  ;;  %2421 = vmatprep.subr.bf16.mxu1 %v634_v35  ;;  %v2699_v29 = vld [vmem:[#allocation5 + $0x48] sm:$0xff]   ;;  %v2704_v34 = vld [vmem:[#allocation5 + $0x70] sm:$0xff]  }
 0x368   : > { %2422 = vmatpush3.bf16.msra.mxu1 %v634_v35  ;;  %v2705_v35 = vld [vmem:[#allocation5 + $0x78] sm:$0xff]  }
 0x369   : > { %v3265_v37 = vadd.f32 %v626_v36, %v624_v30  ;;  %2423 = vmatprep.subr.bf16.mxu1 %v635_v33  ;;  %v2700_v30 = vld [vmem:[#allocation5 + $0x50] sm:$0xff]   ;;  %v2706_v36 = vld [vmem:[#allocation7 + $0x80] sm:$0xff]  }
 0x36c   : > { %2424 = vmatpush3.bf16.msra.mxu1 %v635_v33  ;;  %v2703_v33 = vld [vmem:[#allocation5 + $0x68] sm:$0xff]  }
 0x36d   : > { %2449 = vmatprep.subr.bf16.mxu1 %v2690_v39 }
 0x36f   : > { %2426 = vmatmul.mubr.msk.bf16.vlgmr.msra.gmra.mrb[8].mxu1 %vm350_vm0, %v3234_v0 }
 0x370   : > { %2450 = vmatpush3.bf16.msra.mxu1 %v2690_v39  ;;  %v2708_v39 = vld [vmem:[#allocation7 + $0x90] sm:$0xff]  }
 0x371   : > { %2451 = vmatprep.subr.bf16.mxu1 %v2691_v40 }
 0x374   : > { %2452 = vmatpush3.bf16.msra.mxu1 %v2691_v40  ;;  %v2709_v40 = vld [vmem:[#allocation7 + $0x98] sm:$0xff]  }
 0x375   : > { %2453 = vmatprep.subr.bf16.mxu1 %v2692_v41 }
 0x378   : > { %2454 = vmatpush3.bf16.msra.mxu1 %v2692_v41  ;;  %v2710_v41 = vld [vmem:[#allocation7 + $0xa0] sm:$0xff]  }
 0x379   : > { %2455 = vmatprep.subr.bf16.mxu1 %v2693_v42 }
 0x37c   : > { %2456 = vmatpush3.bf16.msra.mxu1 %v2693_v42  ;;  %v2711_v42 = vld [vmem:[#allocation7 + $0xa8] sm:$0xff]  }
 0x37d   : > { %2457 = vmatprep.subr.bf16.mxu1 %v2694_v44 }
 0x380   : > { %2458 = vmatpush3.bf16.msra.mxu1 %v2694_v44 }
 0x381   : > { %2459 = vmatprep.subr.bf16.mxu1 %v2695_v46 }
 0x384   : > { %2460 = vmatpush3.bf16.msra.mxu1 %v2695_v46 }
 0x385   : > { %2461 = vmatprep.subr.bf16.mxu1 %v2696_v53 }
 0x388   : > { %2462 = vmatpush3.bf16.msra.mxu1 %v2696_v53  ;;  %v2169_v53 = vld [vmem:[%s3372_s4 + $0x4] sm:$0x3] }
 0x389   : > { %2463 = vmatprep.subr.bf16.mxu1 %v2697_v54 }
 0x38c   : > { %2464 = vmatpush3.bf16.msra.mxu1 %v2697_v54  ;;  %v1018_v54 = vrot.slane %v2169_v53, %v3251_v45 }
 0x38d   : > { %2497 = vmatprep.subr.bf16.mxu1 %v2706_v36 }
 0x442   : > { %v2427_v47 = vpop.f32.mrb[8].mxu1 }
 0x443   : > { %v672_v48 = vpop.f32.mrb[9].mxu1 }
 0x444   : > { %v2428_v49 = vpop.f32.mrb[10].mxu1 }
 0x445   : > { %v688_v50 = vpack.c.bf16 %v2428_v49, %v2427_v47  ;;  %v675_v51 = vpop.f32.mrb[11].mxu1 }
 0x446   : > { %v687_v52 = vpack.c.bf16 %v675_v51, %v672_v48  ;;  %v2712_v51 = vld [vmem:[#allocation7 + $0xb0] sm:$0xff]  }
 0x448   : > { %2445 = vmatprep.mubr.bf16.mxu0 %v687_v52  ;;  %v2713_v52 = vld [vmem:[#allocation7 + $0xb8] sm:$0xff]  }
 0x449   : > { %2446 = vmatmul.mubr.bf16.vlgmr.msra.gmra.mrb[0].mxu0 %v688_v50 }
 0x44a   : > { %2473 = vmatprep.mubr.msk.bf16.mxu0 %vm350_vm0, %v3236_v1 }
 0x51c   : > { %v2447_v57 = vpop.f32.mrb[0].mxu0 }
 0x51d   : > { %v800_v58 = vadd.f32 %v2447_v57, %v708_v56  ;;  %v791_v59 = vpop.f32.mrb[1].mxu0 }
 0x51e   : > { %v792_v60 = vadd.f32 %v791_v59, %v708_v56  ;;  %v2448_v61 = vpop.f32.mrb[2].mxu0 }
 0x51f   : > { %v803_v62 = vadd.f32 %v2448_v61, %v708_v56  ;;  %v794_v63 = vpop.f32.mrb[3].mxu0  ;;  %v808_v3 = vmax.f32 %v800_v58, 0.0 }
 0x520   : > { %v795_v2 = vadd.f32 %v794_v63, %v708_v56  ;;  %v806_v5 = vmax.f32 %v792_v60, 0.0 }
 0x521   : > { %v809_v4 = vmax.f32 %v803_v62, 0.0 }
 0x522   : > { %v807_v6 = vmax.f32 %v795_v2, 0.0 }
 0x523   : > { %v811_v7 = vpack.c.bf16 %v809_v4, %v808_v3 }
 0x524   : > { %v810_v8 = vpack.c.bf16 %v807_v6, %v806_v5  ;;  %v1142_v6 = vrot.slane %v2169_v53, %v3262_v19 }
 0x526   : > { %2465 = vmatprep.mubr.bf16.mxu1 %v810_v8 }
 0x527   : > { %2466 = vmatmul.mubr.bf16.vlgmr.msra.gmra.mrb[12].mxu1 %v811_v7 }
 0x528   : > { %2498 = vmatpush3.bf16.msra.mxu1 %v2706_v36  ;;  %v2740_v36 = vld [vmem:[#allocation7 + $0xd0] sm:$0xff]  }
 0x529   : > { %2499 = vmatprep.subr.bf16.mxu1 %v2707_v38 }
 0x52c   : > { %2500 = vmatpush3.bf16.msra.mxu1 %v2707_v38  ;;  %v2741_v38 = vld [vmem:[#allocation7 + $0xd8] sm:$0xff]  }
 0x52d   : > { %2501 = vmatprep.subr.bf16.mxu1 %v2708_v39 }
 0x530   : > { %2502 = vmatpush3.bf16.msra.mxu1 %v2708_v39  ;;  %v2742_v39 = vld [vmem:[#allocation7 + $0xe0] sm:$0xff]  }
 0x531   : > { %2503 = vmatprep.subr.bf16.mxu1 %v2709_v40 }
 0x534   : > { %2504 = vmatpush3.bf16.msra.mxu1 %v2709_v40  ;;  %v2743_v40 = vld [vmem:[#allocation7 + $0xe8] sm:$0xff]  }
 0x535   : > { %2505 = vmatprep.subr.bf16.mxu1 %v2710_v41 }
 0x538   : > { %2506 = vmatpush3.bf16.msra.mxu1 %v2710_v41  ;;  %v628_v41 = vrot.slane %v3265_v37, 4 }
 0x539   : > { %2507 = vmatprep.subr.bf16.mxu1 %v2711_v42 }
 0x53c   : > { %2508 = vmatpush3.bf16.msra.mxu1 %v2711_v42  ;;  %v629_v42 = vadd.f32 %v628_v41, %v3265_v37  ;;  %v2726_v37 = vld [vmem:[#allocation8 + $0x50] sm:$0xff]  }
 0x53d   : > { %2509 = vmatprep.subr.bf16.mxu1 %v2712_v51  ;;  %v2750_v41 = vld [vmem:[#allocation8 + $0xd0] sm:$0xff]  }
 0x540   : > { %2510 = vmatpush3.bf16.msra.mxu1 %v2712_v51 }
 0x541   : > { %2511 = vmatprep.subr.bf16.mxu1 %v2713_v52 }
 0x544   : > { %2512 = vmatpush3.bf16.msra.mxu1 %v2713_v52 }
 0x5fa   : > { %v2467_v10 = vpop.f32.mrb[12].mxu1 }
 0x5fb   : > { %v924_v11 = vadd.f32 %v2467_v10, %v832_v9  ;;  %v915_v12 = vpop.f32.mrb[13].mxu1 }
 0x5fc   : > { %v916_v13 = vadd.f32 %v915_v12, %v832_v9  ;;  %v2468_v14 = vpop.f32.mrb[14].mxu1 }
 0x5fd   : > { %v927_v15 = vadd.f32 %v2468_v14, %v832_v9  ;;  %v918_v16 = vpop.f32.mrb[15].mxu1  ;;  %v932_v18 = vmax.f32 %v924_v11, 0.0 }
 0x5fe   : > { %v919_v17 = vadd.f32 %v918_v16, %v832_v9  ;;  %v930_v21 = vmax.f32 %v916_v13, 0.0 }
 0x5ff   : > { %v933_v20 = vmax.f32 %v927_v15, 0.0 }
 0x600   : > { %v931_v22 = vmax.f32 %v919_v17, 0.0 }
 0x601   : > { %v944_v23 = vpack.c.bf16 %v933_v20, %v932_v18 }
 0x602   : > { %v934_v24 = vadd.f32 %v931_v22, %v930_v21  ;;  %v943_v25 = vpack.c.bf16 %v931_v22, %v930_v21 }
 0x604   : > { %v935_v26 = vadd.f32 %v934_v24, %v932_v18  ;;  %2469 = vmatprep.subr.bf16.mxu0 %v943_v25 }
 0x605   : > { %2470 = vmatpush3.bf16.msra.mxu0 %v943_v25  ;;  %v2714_v25 = vld [vmem:[#allocation5 + $0x80] sm:$0xff]  }
 0x606   : > { %v3276_v27 = vadd.f32 %v935_v26, %v933_v20  ;;  %2471 = vmatprep.subr.bf16.mxu0 %v944_v23  ;;  %v2715_v26 = vld [vmem:[#allocation5 + $0x88] sm:$0xff]  }
 0x609   : > { %2472 = vmatpush3.bf16.msra.mxu0 %v944_v23 }
 0x60a   : > { %2477 = vmatprep.subr.bf16.mxu0 %v2698_v28 }
 0x60c   : > { %2474 = vmatmul.mubr.msk.bf16.vlgmr.msra.gmra.mrb[4].mxu0 %vm350_vm0, %v3234_v0 }
 0x60d   : > { %2478 = vmatpush3.bf16.msra.mxu0 %v2698_v28  ;;  %v2716_v28 = vld [vmem:[#allocation5 + $0x90] sm:$0xff]  }
 0x60e   : > { %2479 = vmatprep.subr.bf16.mxu0 %v2699_v29 }
 0x611   : > { %2480 = vmatpush3.bf16.msra.mxu0 %v2699_v29  ;;  %v2717_v29 = vld [vmem:[#allocation5 + $0x98] sm:$0xff]  }
 0x612   : > { %2481 = vmatprep.subr.bf16.mxu0 %v2700_v30 }
 0x615   : > { %2482 = vmatpush3.bf16.msra.mxu0 %v2700_v30  ;;  %v2718_v30 = vld [vmem:[#allocation5 + $0xa0] sm:$0xff]  }
 0x616   : > { %2483 = vmatprep.subr.bf16.mxu0 %v2701_v31 }
 0x619   : > { %2484 = vmatpush3.bf16.msra.mxu0 %v2701_v31  ;;  %v2719_v31 = vld [vmem:[#allocation5 + $0xa8] sm:$0xff]  }
 0x61a   : > { %2485 = vmatprep.subr.bf16.mxu0 %v2702_v32 }
 0x61d   : > { %2486 = vmatpush3.bf16.msra.mxu0 %v2702_v32  ;;  %v2720_v32 = vld [vmem:[#allocation5 + $0xb0] sm:$0xff]  }
 0x61e   : > { %2487 = vmatprep.subr.bf16.mxu0 %v2703_v33 }
 0x621   : > { %2488 = vmatpush3.bf16.msra.mxu0 %v2703_v33  ;;  %v2721_v33 = vld [vmem:[#allocation5 + $0xb8] sm:$0xff]  }
 0x622   : > { %2489 = vmatprep.subr.bf16.mxu0 %v2704_v34 }
 0x625   : > { %2490 = vmatpush3.bf16.msra.mxu0 %v2704_v34  ;;  %v2738_v34 = vld [vmem:[#allocation7 + $0xc0] sm:$0xff]  }
 0x626   : > { %2491 = vmatprep.subr.bf16.mxu0 %v2705_v35  ;;  %2545 = vmatprep.subr.bf16.mxu1 %v2738_v34 }
 0x629   : > { %2492 = vmatpush3.bf16.msra.mxu0 %v2705_v35  ;;  %v2739_v35 = vld [vmem:[#allocation7 + $0xc8] sm:$0xff]  }
 0x6df   : > { %v2475_v44 = vpop.f32.mrb[4].mxu0 }
 0x6e0   : > { %v981_v46 = vpop.f32.mrb[5].mxu0 }
 0x6e1   : > { %v2476_v47 = vpop.f32.mrb[6].mxu0 }
 0x6e2   : > { %v997_v48 = vpack.c.bf16 %v2476_v47, %v2475_v44  ;;  %v984_v49 = vpop.f32.mrb[7].mxu0  ;;  %v630_v44 = vrot.slane %v629_v42, 2 }
 0x6e3   : > { %v996_v50 = vpack.c.bf16 %v984_v49, %v981_v46 }
 0x6e4   : > { %v631_v46 = vadd.f32 %v630_v44, %v629_v42  ;;  %v2751_v42 = vld [vmem:[#allocation8 + $0x90] sm:$0xff]   ;;  %v937_v44 = vrot.slane %v3276_v27, 4 }
 0x6e5   : > { %2493 = vmatprep.mubr.bf16.mxu0 %v996_v50 }
 0x6e6   : > { %2494 = vmatmul.mubr.bf16.vlgmr.msra.gmra.mrb[8].mxu0 %v997_v48  ;;  %v632_v47 = vrot.slane %v631_v46, 1 }
 0x6e7   : > { %2521 = vmatprep.mubr.msk.bf16.mxu0 %vm350_vm0, %v3236_v1 }
 0x6e8   : > { %v633_v51 = vadd.f32 %v632_v47, %v631_v46  ;;  %v2752_v46 = vld [vmem:[#allocation8 + $0xd8] sm:$0xff]  }
 0x6e9   : > { %v2753_v47 = vld [vmem:[#allocation8 + $0x98] sm:$0xff]  }
 0x7b9   : > { %v2495_v55 = vpop.f32.mrb[8].mxu0 }
 0x7ba   : > { %v1110_v56 = vadd.f32 %v2495_v55, %v1018_v54  ;;  %v1101_v57 = vpop.f32.mrb[9].mxu0  ;;  %v2723_v55 = vld [vmem:[#allocation8] sm:$0xff]  }
 0x7bb   : > { %v1102_v58 = vadd.f32 %v1101_v57, %v1018_v54  ;;  %v2496_v59 = vpop.f32.mrb[10].mxu0  ;;  %v1564_v57 = vpack.c.bf16 %v633_v51, %v633_v51 }
 0x7bc   : > { %v1113_v60 = vadd.f32 %v2496_v59, %v1018_v54  ;;  %v1104_v61 = vpop.f32.mrb[11].mxu0  ;;  %v1118_v62 = vmax.f32 %v1110_v56, 0.0  ;;  %v2724_v56 = vld [vmem:[#allocation8 + $0x48] sm:$0xff]   ;;  %v2727_v59 = vld [vmem:[#allocation8 + $0x10] sm:$0xff]  }
 0x7bd   : > { %v1105_v1 = vadd.f32 %v1104_v61, %v1018_v54  ;;  %v1116_v2 = vmax.f32 %v1102_v58, 0.0  ;;  %v2725_v58 = vld [vmem:[#allocation8 + $0x8] sm:$0xff]   ;;  %v2729_v61 = vld [vmem:[#allocation8 + $0x18] sm:$0xff]  }
 0x7be   : > { %v1119_v63 = vmax.f32 %v1113_v60, 0.0  ;;  %v2728_v60 = vld [vmem:[#allocation8 + $0x58] sm:$0xff]  }
 0x7bf   : > { %v1117_v3 = vmax.f32 %v1105_v1, 0.0  ;;  %v2730_v1 = vld [vmem:[#allocation8 + $0x60] sm:$0xff]  }
 0x7c0   : > { %v1121_v4 = vpack.c.bf16 %v1119_v63, %v1118_v62  ;;  %v2731_v62 = vld [vmem:[#allocation8 + $0x20] sm:$0xff]   ;;  %v2732_v63 = vld [vmem:[#allocation8 + $0x68] sm:$0xff]  }
 0x7c1   : > { %v1120_v5 = vpack.c.bf16 %v1117_v3, %v1116_v2  ;;  %v2733_v2 = vld [vmem:[#allocation8 + $0x28] sm:$0xff]   ;;  %v2734_v3 = vld [vmem:[#allocation8 + $0x70] sm:$0xff]  }
 0x7c3   : > { %2513 = vmatprep.mubr.bf16.mxu1 %v1120_v5  ;;  %v2736_v5 = vld [vmem:[#allocation8 + $0x78] sm:$0xff]  }
 0x7c4   : > { %2514 = vmatmul.mubr.bf16.vlgmr.msra.gmra.mrb[16].mxu1 %v1121_v4  ;;  %v2735_v4 = vld [vmem:[#allocation8 + $0x30] sm:$0xff]  }
 0x7c5   : > { %2546 = vmatpush3.bf16.msra.mxu1 %v2738_v34 }
 0x7c6   : > { %2547 = vmatprep.subr.bf16.mxu1 %v2739_v35 }
 0x7c9   : > { %2548 = vmatpush3.bf16.msra.mxu1 %v2739_v35 }
 0x7ca   : > { %2549 = vmatprep.subr.bf16.mxu1 %v2740_v36 }
 0x7cd   : > { %2550 = vmatpush3.bf16.msra.mxu1 %v2740_v36 }
 0x7ce   : > { %2551 = vmatprep.subr.bf16.mxu1 %v2741_v38 }
 0x7d1   : > { %2552 = vmatpush3.bf16.msra.mxu1 %v2741_v38  ;;  %v2747_v38 = vld [vmem:[#allocation8 + $0x80] sm:$0xff]  }
 0x7d2   : > { %2553 = vmatprep.subr.bf16.mxu1 %v2742_v39 }
 0x7d5   : > { %2554 = vmatpush3.bf16.msra.mxu1 %v2742_v39  ;;  %v2748_v39 = vld [vmem:[#allocation8 + $0xc8] sm:$0xff]  }
 0x7d6   : > { %2555 = vmatprep.subr.bf16.mxu1 %v2743_v40 }
 0x7d9   : > { %2556 = vmatpush3.bf16.msra.mxu1 %v2743_v40  ;;  %v2749_v40 = vld [vmem:[#allocation8 + $0x88] sm:$0xff]  }
 0x897   : > { %v2515_v7 = vpop.f32.mrb[16].mxu1 }
 0x898   : > { %v1234_v8 = vadd.f32 %v2515_v7, %v1142_v6  ;;  %v1225_v9 = vpop.f32.mrb[17].mxu1  ;;  %v2737_v7 = vld [vmem:[#allocation8 + $0x38] sm:$0xff]  }
 0x899   : > { %v1226_v10 = vadd.f32 %v1225_v9, %v1142_v6  ;;  %v2516_v11 = vpop.f32.mrb[18].mxu1 }
 0x89a   : > { %v1237_v12 = vadd.f32 %v2516_v11, %v1142_v6  ;;  %v1228_v13 = vpop.f32.mrb[19].mxu1  ;;  %v1242_v15 = vmax.f32 %v1234_v8, 0.0  ;;  %v391_v8 = vstv %s2586_s21  ;;  %v2745_v11 = vld [vmem:[#allocation7 + $0xf8] sm:$0xff]   ;;  %s2892_s21 = scalar_lea.vmem %s2891_s12, 32 }
 0x89b   : > { %v1229_v14 = vadd.f32 %v1228_v13, %v1142_v6  ;;  %v1240_v17 = vmax.f32 %v1226_v10, 0.0  ;;  %v389_v6 = vand.u32 127, %v388_v43  ;;  %v2248_v9 = vpack.c.bf16 %v391_v8, %v391_v8  ;;  %v2744_v10 = vld [vmem:[#allocation7 + $0xf0] sm:$0xff]   ;;  %v2762_v13 = vld [vmem:[#allocation8 + $0x100] sm:$0xff]   ;;  %v2769_v8 = vld [vmem:[#allocation8 + $0x138] sm:$0xff]   ;;  %p2894_p1 = scmp.lt.s32.totalorder %s2892_s21, %s2886_s8 }
 0x89c   : > { %v1243_v16 = vmax.f32 %v1237_v12, 0.0  ;;  %2557 = vmatprep.subr.bf16.mxu1 %v2744_v10  ;;  %v2746_v12 = vld [vmem:[#allocation8 + $0xc0] sm:$0xff]   ;;  %v2970_v43 = vmov 0.0  }
 0x89d   : > { %v1241_v18 = vmax.f32 %v1229_v14, 0.0  ;;  %vm390_vm2 = vcmp.eq.s32.totalorder %v389_v6, 0  ;;  %2558 = vmatpush3.bf16.msra.mxu1 %v2744_v10  ;;  %v2767_v6 = vld [vmem:[#allocation8 + $0x128] sm:$0xff]   ;;  %p2895_p2 = por %p2894_p1, %p2893_p12 }
 0x89e   : > { %v1254_v20 = vpack.c.bf16 %v1243_v16, %v1242_v15  ;;  %vm2247_vm3 = vmpackc.low %vm390_vm2, %vm390_vm2  ;;  %2559 = vmatprep.subr.bf16.mxu1 %v2745_v11 }
 0x89f   : > { %v1244_v21 = vadd.f32 %v1241_v18, %v1240_v17  ;;  %v1253_v22 = vpack.c.bf16 %v1241_v18, %v1240_v17  ;;  %p2896_p4 = pnand %p2895_p2, %p2889_p7 }
 0x8a1   : > { %v1245_v23 = vadd.f32 %v1244_v21, %v1242_v15  ;;  %2517 = vmatprep.subr.bf16.mxu0 %v1253_v22  ;;  %2560 = vmatpush3.bf16.msra.mxu1 %v2745_v11 }
 0x8a2   : > { %2518 = vmatpush3.bf16.msra.mxu0 %v1253_v22  ;;  %2362 = vmatprep.subr.bf16.mxu1 %v2746_v12 }
 0x8a3   : > { %v3287_v24 = vadd.f32 %v1245_v23, %v1243_v16  ;;  %2519 = vmatprep.subr.bf16.mxu0 %v1254_v20  ;;  %v3301_v16 = vld [vmem:[%s3372_s4 + $0x6] sm:$0x3] }
 0x8a4   : > { %v1328_v18 = vrot.slane %v3301_v16, %v3251_v45 }
 0x8a5   : > { %v1247_v14 = vrot.slane %v3287_v24, 4 }
 0x8a6   : > { %2520 = vmatpush3.bf16.msra.mxu0 %v1254_v20 }
 0x8a7   : > { %2525 = vmatprep.subr.bf16.mxu0 %v2714_v25  ;;  %v1248_v15 = vadd.f32 %v1247_v14, %v3287_v24 }
 0x8a9   : > { %2522 = vmatmul.mubr.msk.bf16.vlgmr.msra.gmra.mrb[12].mxu0 %vm350_vm0, %v3234_v0  ;;  %v2722_v0 = vld [vmem:[#allocation8 + $0x40] sm:$0xff]   ;;  %v1249_v17 = vrot.slane %v1248_v15, 2 }
 0x8aa   : > { %2526 = vmatpush3.bf16.msra.mxu0 %v2714_v25 }
 0x8ab   : > { %2527 = vmatprep.subr.bf16.mxu0 %v2715_v26  ;;  %v1250_v20 = vadd.f32 %v1249_v17, %v1248_v15 }
 0x8ae   : > { %2528 = vmatpush3.bf16.msra.mxu0 %v2715_v26 }
 0x8af   : > { %2529 = vmatprep.subr.bf16.mxu0 %v2716_v28 }
 0x8b2   : > { %2530 = vmatpush3.bf16.msra.mxu0 %v2716_v28  ;;  %v1251_v28 = vrot.slane %v1250_v20, 1 }
 0x8b3   : > { %2531 = vmatprep.subr.bf16.mxu0 %v2717_v29 }
 0x8b4   : > { %v1252_v34 = vadd.f32 %v1251_v28, %v1250_v20 }
 0x8b6   : > { %2532 = vmatpush3.bf16.msra.mxu0 %v2717_v29  ;;  %v1566_v45 = vpack.c.bf16 %v1252_v34, %v1252_v34 }
 0x8b7   : > { %2533 = vmatprep.subr.bf16.mxu0 %v2718_v30 }
 0x8ba   : > { %2534 = vmatpush3.bf16.msra.mxu0 %v2718_v30 }
 0x8bb   : > { %2535 = vmatprep.subr.bf16.mxu0 %v2719_v31 }
 0x8be   : > { %2536 = vmatpush3.bf16.msra.mxu0 %v2719_v31 }
 0x8bf   : > { %2537 = vmatprep.subr.bf16.mxu0 %v2720_v32 }
 0x8c2   : > { %2538 = vmatpush3.bf16.msra.mxu0 %v2720_v32 }
 0x8c3   : > { %2539 = vmatprep.subr.bf16.mxu0 %v2721_v33 }
 0x8c6   : > { %2540 = vmatpush3.bf16.msra.mxu0 %v2721_v33 }
 0x8c7   : > { %2340 = vmatprep.subr.bf16.mxu0 %v2722_v0 }
 0x97c   : > { %v2523_v48 = vpop.f32.mrb[12].mxu0 }
 0x97d   : > { %v1291_v49 = vpop.f32.mrb[13].mxu0 }
 0x97e   : > { %v2524_v50 = vpop.f32.mrb[14].mxu0 }
 0x97f   : > { %v1307_v52 = vpack.c.bf16 %v2524_v50, %v2523_v48  ;;  %v1294_v53 = vpop.f32.mrb[15].mxu0  ;;  %v938_v48 = vadd.f32 %v937_v44, %v3276_v27  ;;  %v2755_v50 = vld [vmem:[#allocation8 + $0xa0] sm:$0xff]  }
 0x980   : > { %v1306_v54 = vpack.c.bf16 %v1294_v53, %v1291_v49  ;;  %v2754_v49 = vld [vmem:[#allocation8 + $0xe0] sm:$0xff]   ;;  %v2757_v53 = vld [vmem:[#allocation8 + $0xa8] sm:$0xff]  }
 0x981   : > { %v939_v51 = vrot.slane %v938_v48, 2 }
 0x982   : > { %2541 = vmatprep.mubr.bf16.mxu0 %v1306_v54  ;;  %v2758_v54 = vld [vmem:[#allocation8 + $0xf0] sm:$0xff]  }
 0x983   : > { %2542 = vmatmul.mubr.bf16.vlgmr.msra.gmra.mrb[16].mxu0 %v1307_v52  ;;  %v2756_v52 = vld [vmem:[#allocation8 + $0xe8] sm:$0xff]  }
 0x984   : > { %2341 = vmatpush3.bf16.msra.mxu0 %v2723_v55  ;;  %1920 = vmatprep.mubr.bf16.mxu0 %v1564_v57  ;;  %v940_v55 = vadd.f32 %v939_v51, %v938_v48  ;;  %v2759_v57 = vld [vmem:[#allocation8 + $0xb0] sm:$0xff]  }
 0x985   : > { %2342 = vmatprep.subr.bf16.mxu0 %v2724_v56 }
 0x988   : > { %2343 = vmatpush3.bf16.msra.mxu0 %v2725_v58 }
 0x989   : > { %2344 = vmatprep.subr.bf16.mxu0 %v2726_v37  ;;  %v2760_v37 = vld [vmem:[#allocation8 + $0xf8] sm:$0xff]  }
 0x98c   : > { %2345 = vmatpush3.bf16.msra.mxu0 %v2727_v59  ;;  %v941_v59 = vrot.slane %v940_v55, 1 }
 0x98d   : > { %2346 = vmatprep.subr.bf16.mxu0 %v2728_v60 }
 0x990   : > { %2347 = vmatpush3.bf16.msra.mxu0 %v2729_v61 }
 0x991   : > { %2348 = vmatprep.subr.bf16.mxu0 %v2730_v1  ;;  %v2761_v1 = vld [vmem:[#allocation8 + $0xb8] sm:$0xff]  }
 0x994   : > { %2349 = vmatpush3.bf16.msra.mxu0 %v2731_v62  ;;  %v942_v62 = vadd.f32 %v941_v59, %v940_v55 }
 0x995   : > { %2350 = vmatprep.subr.bf16.mxu0 %v2732_v63 }
 0x996   : > { %v1565_v63 = vpack.c.bf16 %v942_v62, %v942_v62 }
 0x998   : > { %2351 = vmatpush3.bf16.msra.mxu0 %v2733_v2  ;;  %v2763_v2 = vld [vmem:[#allocation8 + $0x108] sm:$0xff]  }
 0x999   : > { %2352 = vmatprep.subr.bf16.mxu0 %v2734_v3  ;;  %v2764_v3 = vld [vmem:[#allocation8 + $0x110] sm:$0xff]  }
 0x99c   : > { %2353 = vmatpush3.bf16.msra.mxu0 %v2735_v4  ;;  %v2765_v4 = vld [vmem:[#allocation8 + $0x118] sm:$0xff]  }
 0x99d   : > { %2354 = vmatprep.subr.bf16.mxu0 %v2736_v5  ;;  %v2766_v5 = vld [vmem:[#allocation8 + $0x120] sm:$0xff]  }
 0x9a0   : > { %2355 = vmatpush3.bf16.msra.mxu0 %v2737_v7  ;;  %v2768_v7 = vld [vmem:[#allocation8 + $0x130] sm:$0xff]  }
 0x9a1   : > { %2565 = vmatprep.subr.bf16.mxu0 %v2970_v43 }
 0x9a3   : > { %2249 = vmatmul.mubr.msk.bf16.vlgmr.msra.gmra.mrb[20].mxu0 %vm2247_vm3, %v2248_v9  ;;  %v1452_v9 = vrot.slane %v3301_v16, %v3262_v19 }
 0x9a4   : > { %2566 = vmatpush3.bf16.msra.mxu0 %v2762_v13  ;;  %2581 = vmatprep.mubr.msk.bf16.mxu0 %vm2971_vm4, %v2970_v43 }
 0x9a5   : > { %2567 = vmatprep.subr.bf16.mxu0 %v2970_v43 }
 0x9a8   : > { %2568 = vmatpush3.bf16.msra.mxu0 %v2763_v2 }
 0x9a9   : > { %2569 = vmatprep.subr.bf16.mxu0 %v2970_v43 }
 0x9ac   : > { %2570 = vmatpush3.bf16.msra.mxu0 %v2764_v3 }
 0x9ad   : > { %2571 = vmatprep.subr.bf16.mxu0 %v2970_v43 }
 0x9b0   : > { %2572 = vmatpush3.bf16.msra.mxu0 %v2765_v4 }
 0x9b1   : > { %2573 = vmatprep.subr.bf16.mxu0 %v2970_v43 }
 0x9b4   : > { %2574 = vmatpush3.bf16.msra.mxu0 %v2766_v5 }
 0x9b5   : > { %2575 = vmatprep.subr.bf16.mxu0 %v2970_v43 }
 0x9b8   : > { %2576 = vmatpush3.bf16.msra.mxu0 %v2767_v6 }
 0x9b9   : > { %2577 = vmatprep.subr.bf16.mxu0 %v2970_v43 }
 0x9bc   : > { %2578 = vmatpush3.bf16.msra.mxu0 %v2768_v7 }
 0x9bd   : > { %2579 = vmatprep.subr.bf16.mxu0 %v2970_v43 }
 0x9c0   : > { %2580 = vmatpush3.bf16.msra.mxu0 %v2769_v8 }
 0xa56   : > { %v2543_v21 = vpop.f32.mrb[16].mxu0 }
 0xa57   : > { %v1420_v22 = vadd.f32 %v2543_v21, %v1328_v18  ;;  %v1411_v23 = vpop.f32.mrb[17].mxu0 }
 0xa58   : > { %v1412_v25 = vadd.f32 %v1411_v23, %v1328_v18  ;;  %v2544_v26 = vpop.f32.mrb[18].mxu0 }
 0xa59   : > { %v1423_v29 = vadd.f32 %v2544_v26, %v1328_v18  ;;  %v1414_v30 = vpop.f32.mrb[19].mxu0  ;;  %v1428_v24 = vmax.f32 %v1420_v22, 0.0 }
 0xa5a   : > { %v1415_v31 = vadd.f32 %v1414_v30, %v1328_v18  ;;  %v1426_v33 = vmax.f32 %v1412_v25, 0.0 }
 0xa5b   : > { %v1429_v32 = vmax.f32 %v1423_v29, 0.0 }
 0xa5c   : > { %v1427_v0 = vmax.f32 %v1415_v31, 0.0 }
 0xa5d   : > { %v1431_v35 = vpack.c.bf16 %v1429_v32, %v1428_v24 }
 0xa5e   : > { %v1430_v36 = vpack.c.bf16 %v1427_v0, %v1426_v33 }
 0xa60   : > { %2561 = vmatprep.mubr.bf16.mxu1 %v1430_v36 }
 0xa61   : > { %2562 = vmatmul.mubr.bf16.vlgmr.msra.gmra.mrb[20].mxu1 %v1431_v35 }
 0xa62   : > { %2363 = vmatpush3.bf16.msra.mxu1 %v2747_v38  ;;  %1960 = vmatprep.mubr.bf16.mxu1 %v1566_v45 }
 0xa63   : > { %2364 = vmatprep.subr.bf16.mxu1 %v2748_v39 }
 0xa66   : > { %2365 = vmatpush3.bf16.msra.mxu1 %v2749_v40  ;;  %v2009_v40 = vld [vmem:[%s3374_s6] sm:$0x1] }
 0xa67   : > { %2366 = vmatprep.subr.bf16.mxu1 %v2750_v41 }
 0xa6a   : > { %2367 = vmatpush3.bf16.msra.mxu1 %v2751_v42 }
 0xa6b   : > { %2368 = vmatprep.subr.bf16.mxu1 %v2752_v46 }
 0xa6e   : > { %2369 = vmatpush3.bf16.msra.mxu1 %v2753_v47 }
 0xa6f   : > { %2370 = vmatprep.subr.bf16.mxu1 %v2754_v49 }
 0xa72   : > { %2371 = vmatpush3.bf16.msra.mxu1 %v2755_v50 }
 0xa73   : > { %2372 = vmatprep.subr.bf16.mxu1 %v2756_v52 }
 0xa76   : > { %v2356_v56 = vpop.f32.mrb[20].mxu0  ;;  %2373 = vmatpush3.bf16.msra.mxu1 %v2757_v53 }
 0xa77   : > { %v2357_v58 = vpop.f32.mrb[21].mxu0  ;;  %2374 = vmatprep.subr.bf16.mxu1 %v2758_v54 }
 0xa78   : > { %v2358_v27 = vadd.f32 %v2357_v58, %v2356_v56  ;;  %v2359_v60 = vpop.f32.mrb[22].mxu0 }
 0xa79   : > { %v2360_v61 = vpop.f32.mrb[23].mxu0 }
 0xa7a   : > { %2375 = vmatpush3.bf16.msra.mxu1 %v2759_v57 }
 0xa7b   : > { %2376 = vmatprep.subr.bf16.mxu1 %v2760_v37 }
 0xa7e   : > { %2377 = vmatpush3.bf16.msra.mxu1 %v2761_v1 }
 0xa81   : > { %1961 = vmatmul.mubr.bf16.vlgmr.msra.gmra.mrb[24].mxu1 %v1565_v63 }
 0xb34   : > { %v2563_v10 = vpop.f32.mrb[20].mxu1 }
 0xb35   : > { %v1535_v11 = vpop.f32.mrb[21].mxu1  ;;  %v1544_v15 = vadd.f32 %v2563_v10, %v1452_v9 }
 0xb36   : > { %v1536_v12 = vadd.f32 %v1535_v11, %v1452_v9  ;;  %v2564_v13 = vpop.f32.mrb[22].mxu1 }
 0xb37   : > { %v1538_v14 = vpop.f32.mrb[23].mxu1  ;;  %v1547_v20 = vadd.f32 %v2564_v13, %v1452_v9  ;;  %v1552_v22 = vmax.f32 %v1544_v15, 0.0 }
 0xb38   : > { %v1539_v17 = vadd.f32 %v1538_v14, %v1452_v9  ;;  %v1550_v18 = vmax.f32 %v1536_v12, 0.0 }
 0xb39   : > { %v1553_v25 = vmax.f32 %v1547_v20, 0.0 }
 0xb3a   : > { %v1551_v21 = vmax.f32 %v1539_v17, 0.0 }
 0xb3c   : > { %v1554_v23 = vadd.f32 %v1551_v21, %v1550_v18 }
 0xb3e   : > { %v1555_v26 = vadd.f32 %v1554_v23, %v1552_v22 }
 0xb40   : > { %v1556_v28 = vadd.f32 %v1555_v26, %v1553_v25 }
 0xb42   : > { %v1557_v43 = vrot.slane %v1556_v28, 4 }
 0xb44   : > { %v1558_v29 = vadd.f32 %v1557_v43, %v1556_v28 }
 0xb46   : > { %v1559_v30 = vrot.slane %v1558_v29, 2 }
 0xb48   : > { %v1560_v31 = vadd.f32 %v1559_v30, %v1558_v29 }
 0xb4a   : > { %v1561_v19 = vrot.slane %v1560_v31, 1 }
 0xb4c   : > { %v1562_v16 = vadd.f32 %v1561_v19, %v1560_v31 }
 0xb4e   : > { %v1567_v24 = vpack.c.bf16 %v1562_v16, %v1562_v16 }
 0xb50   : > { %2582 = vmatmul.mubr.bf16.vlgmr.msra.gmra.mrb[24].mxu0 %v1567_v24 }
 0xb54   : > { %v2378_v32 = vpop.f32.mrb[24].mxu1 }
 0xb55   : > { %v2379_v33 = vpop.f32.mrb[25].mxu1 }
 0xb56   : > { %v2380_v0 = vadd.f32 %v2379_v33, %v2378_v32  ;;  %v2381_v34 = vpop.f32.mrb[26].mxu1 }
 0xb57   : > { %v2382_v35 = vpop.f32.mrb[27].mxu1 }
 0xb58   : > { %v1963_v36 = vadd.f32 %v2380_v0, %v2358_v27 }
 0xc23   : > { %v2002_v38 = vpop.f32.mrb[24].mxu0 }
 0xc24   : > { %v2003_v39 = vadd.f32 %v2002_v38, %v1963_v36  ;;  %v2583_v45 = vpop.f32.mrb[25].mxu0 }
 0xc25   : > { %v2005_v41 = vpop.f32.mrb[26].mxu0 }
 0xc26   : > { %v2008_v42 = vmul.f32 0.0010416667, %v2003_v39  ;;  %v2584_v44 = vpop.f32.mrb[27].mxu0 }
 0xc28   : > { %v2010_v46 = vadd.f32 %v2009_v40, %v2008_v42 }
 0xc2a   : > { %v2011_v47 = vadd.f32 0.5, %v2010_v46 }
 0xc2c   : > { %v2012_v48 = vmax.f32 %v2011_v47, 0.0 }
 0xc2e   : > { %v2013_v49 = vmin.f32 %v2012_v48, 1.0 }
 0xc30   : > { %2014 = vst [vmem:[%s339_s30] sm:$0x1] %v2013_v49 }
 0xc31   : > { %2899 = shalt.err (!%p2896_p4)
}
 0xc32   : > { %s2900_s17 = scalar_lea.hbm %s3324_s10, 16  ;;  %s2904_s23 = scalar_lea.hbm %s3375_s7, 32 }
 0xc33   : > { %p2901_p9 = scmp.ne.s32.totalorder %s3324_s10, %s2900_s17  ;;  %p2905_p11 = scmp.lt.u32.totalorder %s3324_s10, %s3375_s7 }
 0xc34   : > { %p2906_p13 = scmp.lt.u32.totalorder %s2904_s23, %s2900_s17  ;;  %p2908_p10 = scmp.lt.u32.totalorder %s2900_s17, %s3324_s10 }
 0xc35   : > { %p2902_p0 = pnand %p2901_p9, %p3167_p5 }
 0xc36   : > { %p2907_p6 = por %p2906_p13, %p2905_p11 }
 0xc37   : > { %p2903_p8 = pneg %p2902_p0 }
 0xc38   : > { %p2909_p3 = por %p2908_p10, %p2907_p6 }
 0xc3a   : > { %p2910_p7 = pnand %p2909_p3, %p2903_p8 }
 0xc3c   : > { %2913 = shalt.err (!%p2910_p7)
}
 0xc3d   : > { %2601 = dma.vmem_to_hbm [thread:$0]  (%p3167_p5), %s3326_s9, 16, %s3324_s10, %s2016_s14  }
 0xc3e PF: > { %s3395_s30 = sld [smem:[#allocation15_spill]]  ;;  %s2040_s13 = sand.u32 1, %s2948_s24  }
 0xc3f   : > { %p3397_p1 = scmp.ge.s32.totalorder %s2960_s27, 2  ;;  %s2041_s15 = scalar_lea.sflag [#allocation4], %s2040_s13 }
 0xc44   : > { %p3396_p12 = scmp.ne.s32.totalorder %s3395_s30, 0 }
 0xc46   : > { %p2618_p2 = pnand %p3397_p1, %p3396_p12 }
 0xc48   : > { %2943 = dma.done.wait (!%p2618_p2), %s2041_s15, 16  }
 0xc49   : > { %2945 = vsyncadd (!%p2618_p2), %s2041_s15, 4294967280  ;;  %p22_p4 = scmp.ge.s32.totalorder %s3153_s22, 4   ;;  %s3398_s24 = smov %s2952_s25 }
 0xc4a   : > { %s3399_s25 = smov %s2956_s26  ;;  %s3400_s26 = smov %s3163_s18 }
 0xc4b   : > { %s3401_s27 = smov %s3153_s22  ;;  %24 = sbr.rel (!%p22_p4) target bundleno = 7 (0x7), region = 113 }
 0xc52   :  { %2045 = vsyncpa [#allocation3], 1 }
 0xc53   :  { %2047 = vsyncpa [#allocation3 + $0x1], 1 }
 0xc54   :  { %2048 = vsyncpa [#allocation6], 1 }
 0xc55   :  { %2049 = vsyncpa [#allocation9], 1 }
 0xc56   :  { %2050 = vsyncpa [#allocation4], 1 }
 0xc57   :  { %2052 = vsyncpa [#allocation4 + $0x1], 1 }

</bundles_post_ra>
